<compile_context>
chip_gen: v6e
topology: v6e:2x2x1
jax: 0.10.0
libtpu: 0.0.40
codegen_flags: <defaults>
</compile_context>

<pallas_src>
import functools
import math

import jax
import jax.numpy as jnp
from jax.experimental import pallas as pl
from jax.experimental.pallas import tpu as pltpu

NUM_FEATURES = 128
NUM_CLASSES = 40
PADDED_CLASSES = 128      # lane-dense output width (multiple of 128)
NEG_INF = -1e30


# ----------------------------- kernels -------------------------------------


def xw_kernel(x_ref, w_ref, z_ref):
    """Z = X @ W for one row tile (feature transform of GCN layer 1)."""
    z_ref[...] = jnp.dot(
        x_ref[...], w_ref[...], preferred_element_type=jnp.float32
    ).astype(z_ref.dtype)


def propagate_transform_kernel(tk, z_resident, a_ref, z_ref, b_ref, w_next_ref,
                               out_ref, acc_ref):
    """One row tile of: relu(A_hat @ Z + b) @ W_next."""
    k = pl.program_id(1)

    @pl.when(k == 0)
    def _():
        acc_ref[...] = jnp.zeros_like(acc_ref)

    if z_resident:
        z_blk = z_ref[pl.ds(pl.multiple_of(k * tk, 128), tk), :]
    else:
        z_blk = z_ref[...]
    acc_ref[...] += jnp.dot(a_ref[...], z_blk, preferred_element_type=jnp.float32)

    @pl.when(k == pl.num_programs(1) - 1)
    def _():
        h = jnp.maximum(acc_ref[...] + b_ref[...], 0.0)          # ReLU in f32
        # dropout(p=0.5, training=False) -> identity
        out_ref[...] = jnp.dot(
            h.astype(w_next_ref.dtype), w_next_ref[...],
            preferred_element_type=jnp.float32,
        ).astype(out_ref.dtype)


def propagate_fc_softmax_kernel(tk, z_resident, a_ref, z_ref, b_ref, wfc_ref,
                                bfc_ref, out_ref, acc_ref):
    """One row tile of: softmax(relu(A_hat @ Z + b2) @ Wfc + bfc) over classes."""
    k = pl.program_id(1)

    @pl.when(k == 0)
    def _():
        acc_ref[...] = jnp.zeros_like(acc_ref)

    if z_resident:
        z_blk = z_ref[pl.ds(pl.multiple_of(k * tk, 128), tk), :]
    else:
        z_blk = z_ref[...]
    acc_ref[...] += jnp.dot(a_ref[...], z_blk, preferred_element_type=jnp.float32)

    @pl.when(k == pl.num_programs(1) - 1)
    def _():
        h = jnp.maximum(acc_ref[...] + b_ref[...], 0.0)          # ReLU in f32
        # dropout(p=0.5, training=False) -> identity
        logits = jnp.dot(
            h.astype(wfc_ref.dtype), wfc_ref[...],
            preferred_element_type=jnp.float32,
        ) + bfc_ref[...]                                          # padded classes = -1e30
        m = jnp.max(logits, axis=-1, keepdims=True)
        e = jnp.exp(logits - m)
        denom = jnp.sum(e, axis=-1, keepdims=True)
        out_ref[...] = (e * pl.reciprocal(denom)).astype(out_ref.dtype)


# ----------------------------- wrapper --------------------------------------


def _round_up(x, m):
    return (x + m - 1) // m * m


def _choose_tiling(n, tm_req, tk_req):
    """Pick (n_pad, tm, tk): tk | n_pad, tm | tk, padding stays ~minimal, and
    grid_rows >= 2 where possible so both v7x TensorCores get work."""
    assert tm_req % 128 == 0 and tk_req % 128 == 0
    n128 = _round_up(n, 128)
    tk = min(tk_req, n128)            # multiple of 128, never larger than the graph
    tm = min(tm_req, tk)
    if tk % tm:
        tm = math.gcd(tm, tk)         # keep tm a divisor of tk (still mult of 128)
    n_pad = _round_up(n, tk)          # pad only to tk -> A_hat area stays ~n^2
    while tm > 128 and n_pad // tm < 2:
        tm //= 2                      # keep >= 2 row tiles for the parallel axis
    return n_pad, tm, tk


def gcn_norm_adj(edge_index, num_nodes, padded_nodes=None):
    """Dense D^-1/2 (A + I) D^-1/2, matching PyG GCNConv defaults. Built directly
    at padded size so the wrapper materializes the N^2 buffer only once."""
    p = num_nodes if padded_nodes is None else padded_nodes
    src, dst = edge_index[0], edge_index[1]
    loop = jnp.arange(num_nodes, dtype=edge_index.dtype)
    src = jnp.concatenate([src, loop])
    dst = jnp.concatenate([dst, loop])
    # message flows source -> target: A[target, source] accumulates edge weight 1
    a = jnp.zeros((p, p), jnp.float32).at[dst, src].add(1.0)
    deg = jnp.sum(a, axis=1)
    dinv = jnp.where(deg > 0.0, jax.lax.rsqrt(deg), 0.0)
    return dinv[:, None] * a * dinv[None, :]


@functools.partial(jax.jit, static_argnames=("tm", "tk"))
def gnn_classifier_forward(x, edge_index, params, *, tm=512, tk=2048):
    """x: [N, NUM_FEATURES] f32; edge_index: [2, E] int32. Returns [N, NUM_CLASSES] f32."""
    n, f = x.shape
    assert f % 128 == 0
    w1, b1, w2, b2, wfc, bfc = params
    hidden = w1.shape[1]
    hp = _round_up(hidden, 128)       # lane-dense hidden width

    n_pad, tm, tk = _choose_tiling(n, tm, tk)
    grid_rows = n_pad // tm
    grid_k = n_pad // tk

    # keep Z resident in VMEM when the (double-buffered) copy fits comfortably;
    # otherwise fall back to streaming (tk, hp) K-blocks.
    z_resident = 2 * n_pad * hp * 2 <= 16 * 1024 * 1024

    a_hat = gcn_norm_adj(edge_index, n, n_pad).astype(jnp.bfloat16)
    xp = jnp.zeros((n_pad, f), jnp.float32).at[:n].set(x).astype(jnp.bfloat16)

    # MXU inputs in bf16 (f32 accumulation); biases / elementwise stay f32.
    # hidden padded 32 -> 128 so z1/z2, acc and all stores are lane-dense.
    w1p = jnp.zeros((f, hp), jnp.float32).at[:, :hidden].set(w1).astype(jnp.bfloat16)
    b1p = jnp.zeros((1, hp), jnp.float32).at[0, :hidden].set(b1)
    w2p = jnp.zeros((hp, hp), jnp.float32).at[:hidden, :hidden].set(w2).astype(jnp.bfloat16)
    b2p = jnp.zeros((1, hp), jnp.float32).at[0, :hidden].set(b2)
    wfcp = (jnp.zeros((hp, PADDED_CLASSES), jnp.float32)
            .at[:hidden, :NUM_CLASSES].set(wfc).astype(jnp.bfloat16))
    bfcp = (jnp.full((1, PADDED_CLASSES), NEG_INF, jnp.float32)
            .at[0, :NUM_CLASSES].set(bfc))

    vmem_cap = 48 * 1024 * 1024       # safe on v7x (64 MiB physical VMEM)
    cp_1d = pltpu.CompilerParams(
        dimension_semantics=("parallel",), vmem_limit_bytes=vmem_cap)
    cp_2d = pltpu.CompilerParams(
        dimension_semantics=("parallel", "arbitrary"), vmem_limit_bytes=vmem_cap)

    z_spec = (pl.BlockSpec((n_pad, hp), lambda i, k: (0, 0)) if z_resident
              else pl.BlockSpec((tk, hp), lambda i, k: (k, 0)))

    # --- pass 1: Z1 = X @ W1 ---
    z1 = pl.pallas_call(
        xw_kernel,
        out_shape=jax.ShapeDtypeStruct((n_pad, hp), jnp.bfloat16),
        grid=(grid_rows,),
        in_specs=[
            pl.BlockSpec((tm, f), lambda i: (i, 0)),
            pl.BlockSpec((f, hp), lambda i: (0, 0)),
        ],
        out_specs=pl.BlockSpec((tm, hp), lambda i: (i, 0)),
        compiler_params=cp_1d,
        cost_estimate=pl.CostEstimate(
            flops=2 * n_pad * f * hp,
            transcendentals=0,
            bytes_accessed=2 * (n_pad * f + f * hp + n_pad * hp)),
    )(xp, w1p)

    # --- pass 2: Z2 = relu(A_hat @ Z1 + b1) @ W2 ---
    z2 = pl.pallas_call(
        functools.partial(propagate_transform_kernel, tk, z_resident),
        out_shape=jax.ShapeDtypeStruct((n_pad, hp), jnp.bfloat16),
        grid=(grid_rows, grid_k),
        in_specs=[
            pl.BlockSpec((tm, tk), lambda i, k: (i, k)),
            z_spec,
            pl.BlockSpec((1, hp), lambda i, k: (0, 0)),
            pl.BlockSpec((hp, hp), lambda i, k: (0, 0)),
        ],
        out_specs=pl.BlockSpec((tm, hp), lambda i, k: (i, 0)),
        scratch_shapes=[pltpu.VMEM((tm, hp), jnp.float32)],
        compiler_params=cp_2d,
        cost_estimate=pl.CostEstimate(
            flops=2 * n_pad * n_pad * hp + 2 * n_pad * hp * hp,
            transcendentals=0,
            bytes_accessed=2 * (n_pad * n_pad + n_pad * hp + hp * hp + n_pad * hp)),
    )(a_hat, z1, b1p, w2p)

    # --- pass 3: P = softmax(relu(A_hat @ Z2 + b2) @ Wfc + bfc) ---
    out_p = pl.pallas_call(
        functools.partial(propagate_fc_softmax_kernel, tk, z_resident),
        out_shape=jax.ShapeDtypeStruct((n_pad, PADDED_CLASSES), jnp.float32),
        grid=(grid_rows, grid_k),
        in_specs=[
            pl.BlockSpec((tm, tk), lambda i, k: (i, k)),
            z_spec,
            pl.BlockSpec((1, hp), lambda i, k: (0, 0)),
            pl.BlockSpec((hp, PADDED_CLASSES), lambda i, k: (0, 0)),
            pl.BlockSpec((1, PADDED_CLASSES), lambda i, k: (0, 0)),
        ],
        out_specs=pl.BlockSpec((tm, PADDED_CLASSES), lambda i, k: (i, 0)),
        scratch_shapes=[pltpu.VMEM((tm, hp), jnp.float32)],
        compiler_params=cp_2d,
        cost_estimate=pl.CostEstimate(
            flops=2 * n_pad * n_pad * hp + 2 * n_pad * hp * PADDED_CLASSES,
            transcendentals=n_pad * PADDED_CLASSES,
            bytes_accessed=2 * (n_pad * n_pad + n_pad * hp + hp * PADDED_CLASSES)
            + 4 * n_pad * PADDED_CLASSES),
    )(a_hat, z2, b2p, wfcp, bfcp)

    return out_p[:n, :NUM_CLASSES]


# ----------------------------- reference & demo -----------------------------


def gnn_reference(x, edge_index, params):
    """Plain-JAX f32 reference of the PyTorch eval-mode forward."""
    a = gcn_norm_adj(edge_index, x.shape[0])
    w1, b1, w2, b2, wfc, bfc = params
    h1 = jnp.maximum(a @ (x @ w1) + b1, 0.0)
    h2 = jnp.maximum(a @ (h1 @ w2) + b2, 0.0)
    return jax.nn.softmax(h2 @ wfc + bfc, axis=1)


def init_params(key, hidden_dim):
    k1, k2, k3, k4, k5, k6 = jax.random.split(key, 6)
    # GCNConv weights stored [in, out]; nn.Linear weight stored transposed as [in, out]
    w1 = jax.random.normal(k1, (NUM_FEATURES, hidden_dim), jnp.float32) * 0.05
    b1 = jax.random.normal(k2, (hidden_dim,), jnp.float32) * 0.05
    w2 = jax.random.normal(k3, (hidden_dim, hidden_dim), jnp.float32) * 0.05
    b2 = jax.random.normal(k4, (hidden_dim,), jnp.float32) * 0.05
    wfc = jax.random.normal(k5, (hidden_dim, NUM_CLASSES), jnp.float32) * 0.05
    bfc = jax.random.normal(k6, (NUM_CLASSES,), jnp.float32) * 0.05
    return (w1, b1, w2, b2, wfc, bfc)


if __name__ == "__main__":
    key = jax.random.PRNGKey(0)
    k_x, k_e, k_p = jax.random.split(key, 3)

    N_NODES = 256
    HIDDEN_DIM = 32
    N_EDGES = 512

    x = jax.random.normal(k_x, (N_NODES, NUM_FEATURES), jnp.float32)
    edge_index = jax.random.randint(k_e, (2, N_EDGES), 0, N_NODES, dtype=jnp.int32)
    params = init_params(k_p, HIDDEN_DIM)

    ref = gnn_reference(x, edge_index, params)

    # default tiling (auto-shrunk to the graph: tiles capped at n, grid_rows>=2)
    out = jax.block_until_ready(gnn_classifier_forward(x, edge_index, params))
    # small explicit tiles so the K reduction/accumulator path is exercised: grid=(2,2)
    out_small = jax.block_until_ready(
        gnn_classifier_forward(x, edge_index, params, tm=128, tk=128))

    for o in (out, out_small):
        assert o.shape == (N_NODES, NUM_CLASSES)
        assert bool(jnp.allclose(jnp.sum(o, axis=1), 1.0, atol=1e-2))
        # bf16 A_hat / activations -> loose tolerance
        assert float(jnp.max(jnp.abs(o - ref))) < 3e-2

    print("KERNEL_OK")
</pallas_src>

<mosaic_0001>
module attributes {stable_mosaic.version = 11 : i64} {
  func.func private @main(%arg0: i32) attributes {dimension_semantics = [#tpu.dimension_semantics<core_parallel>], iteration_bounds = array<i64: 2>, tpu.core_type = #tpu.core_type<sc_scalar_subcore>, window_params = []} {
    return
  }
}

module attributes {stable_mosaic.version = 11 : i64} {
  func.func private @main(%arg0: i32) attributes {dimension_semantics = [#tpu.dimension_semantics<core_parallel>], iteration_bounds = array<i64: 2>, tpu.core_type = #tpu.core_type<sc_scalar_subcore>, window_params = []} {
    return
  }
}

module attributes {stable_mosaic.version = 11 : i64} {
  func.func @xw_kernel(%arg0: i32, %arg1: memref<128x128xbf16, #tpu.memory_space<vmem>>, %arg2: memref<128x128xbf16, #tpu.memory_space<vmem>>, %arg3: memref<128x128xbf16, #tpu.memory_space<vmem>>) attributes {dimension_semantics = [#tpu.dimension_semantics<parallel>], iteration_bounds = array<i64: 2>, scalar_prefetch = 0 : i64, scratch_operands = 0 : i64, tpu.core_type = #tpu.core_type<tc>, window_params = [{transform_indices = @transform_0, window_bounds = array<i64: 128, 128>}, {pipeline_mode = #tpu.pipeline_mode<synchronous>, transform_indices = @transform_1, window_bounds = array<i64: 128, 128>}, {transform_indices = @transform_2, window_bounds = array<i64: 128, 128>}]} {
    %c0 = arith.constant 0 : index
    %c0_0 = arith.constant 0 : index
    %0 = vector.load %arg1[%c0, %c0_0] : memref<128x128xbf16, #tpu.memory_space<vmem>>, vector<128x128xbf16>
    %c0_1 = arith.constant 0 : index
    %c0_2 = arith.constant 0 : index
    %1 = vector.load %arg2[%c0_1, %c0_2] : memref<128x128xbf16, #tpu.memory_space<vmem>>, vector<128x128xbf16>
    %cst = arith.constant dense<0.000000e+00> : vector<128x128xf32>
    %2 = tpu.matmul %0, %1, %cst {dimension_numbers = #tpu.dot_dimension_numbers<[1], [0], [0], [1], [0, 0, 1, 1], [], []>} : vector<128x128xbf16>, vector<128x128xbf16>, vector<128x128xf32> -> vector<128x128xf32>
    %3 = arith.truncf %2 : vector<128x128xf32> to vector<128x128xbf16>
    %c0_3 = arith.constant 0 : index
    %c0_4 = arith.constant 0 : index
    %4 = vector.load %arg3[%c0_3, %c0_4] : memref<128x128xbf16, #tpu.memory_space<vmem>>, vector<128x128xbf16>
    tpu.vector_store %arg3[%c0_3, %c0_4], %3 {strides = array<i32>} : memref<128x128xbf16, #tpu.memory_space<vmem>>, vector<128x128xbf16>,
    return
  }
  func.func @transform_0(%arg0: i32) -> (i32, i32) {
    %c0_i32 = arith.constant 0 : i32
    %c0_i32_0 = arith.constant 0 : i32
    return %arg0, %c0_i32 : i32, i32
  }
  func.func @transform_1(%arg0: i32) -> (i32, i32) {
    %c0_i32 = arith.constant 0 : i32
    %c0_i32_0 = arith.constant 0 : i32
    %c0_i32_1 = arith.constant 0 : i32
    return %c0_i32, %c0_i32_0 : i32, i32
  }
  func.func @transform_2(%arg0: i32) -> (i32, i32) {
    %c0_i32 = arith.constant 0 : i32
    %c0_i32_0 = arith.constant 0 : i32
    return %arg0, %c0_i32 : i32, i32
  }
}

module attributes {stable_mosaic.version = 11 : i64} {
  func.func @propagate_transform_kernel(%arg0: i32, %arg1: i32, %arg2: memref<128x256xbf16, #tpu.memory_space<vmem>>, %arg3: memref<256x128xbf16, #tpu.memory_space<vmem>>, %arg4: memref<1x128xf32, #tpu.memory_space<vmem>>, %arg5: memref<128x128xbf16, #tpu.memory_space<vmem>>, %arg6: memref<128x128xbf16, #tpu.memory_space<vmem>>, %arg7: memref<128x128xf32, #tpu.memory_space<vmem>>) attributes {dimension_semantics = [#tpu.dimension_semantics<parallel>, #tpu.dimension_semantics<arbitrary>], iteration_bounds = array<i64: 2, 1>, scalar_prefetch = 0 : i64, scratch_operands = 1 : i64, tpu.core_type = #tpu.core_type<tc>, window_params = [{transform_indices = @transform_0, window_bounds = array<i64: 128, 256>}, {pipeline_mode = #tpu.pipeline_mode<synchronous>, transform_indices = @transform_1, window_bounds = array<i64: 256, 128>}, {pipeline_mode = #tpu.pipeline_mode<synchronous>, transform_indices = @transform_2, window_bounds = array<i64: 1, 128>}, {pipeline_mode = #tpu.pipeline_mode<synchronous>, transform_indices = @transform_3, window_bounds = array<i64: 128, 128>}, {transform_indices = @transform_4, window_bounds = array<i64: 128, 128>}]} {
    %c0_i32 = arith.constant 0 : i32
    %0 = arith.cmpi eq, %arg1, %c0_i32 : i32
    %1 = arith.extui %0 : i1 to i32
    %c0_i32_0 = arith.constant 0 : i32
    %2 = arith.cmpi ne, %1, %c0_i32_0 : i32
    scf.if %2 {
      %cst_9 = arith.constant 0.000000e+00 : f32
      %15 = vector.broadcast %cst_9 : f32 to vector<128x128xf32>
      %c0_10 = arith.constant 0 : index
      %c0_11 = arith.constant 0 : index
      %16 = vector.load %arg7[%c0_10, %c0_11] : memref<128x128xf32, #tpu.memory_space<vmem>>, vector<128x128xf32>
      tpu.vector_store %arg7[%c0_10, %c0_11], %15 {strides = array<i32>} : memref<128x128xf32, #tpu.memory_space<vmem>>, vector<128x128xf32>,
    } else {
    }
    %c256_i32 = arith.constant 256 : i32
    %3 = arith.muli %arg1, %c256_i32 : i32
    %4 = tpu.assume_multiple %3, 128 : i32
    %5 = arith.index_cast %4 : i32 to index
    %c0 = arith.constant 0 : index
    %6 = vector.load %arg3[%5, %c0] : memref<256x128xbf16, #tpu.memory_space<vmem>>, vector<256x128xbf16>
    %c0_1 = arith.constant 0 : index
    %c0_2 = arith.constant 0 : index
    %7 = vector.load %arg7[%c0_1, %c0_2] : memref<128x128xf32, #tpu.memory_space<vmem>>, vector<128x128xf32>
    %c0_3 = arith.constant 0 : index
    %c0_4 = arith.constant 0 : index
    %8 = vector.load %arg2[%c0_3, %c0_4] : memref<128x256xbf16, #tpu.memory_space<vmem>>, vector<128x256xbf16>
    %cst = arith.constant dense<0.000000e+00> : vector<128x128xf32>
    %9 = tpu.matmul %8, %6, %cst {dimension_numbers = #tpu.dot_dimension_numbers<[1], [0], [0], [1], [0, 0, 1, 1], [], []>} : vector<128x256xbf16>, vector<256x128xbf16>, vector<128x128xf32> -> vector<128x128xf32>
    %10 = arith.addf %7, %9 : vector<128x128xf32>
    %c0_5 = arith.constant 0 : index
    %c0_6 = arith.constant 0 : index
    %11 = vector.load %arg7[%c0_5, %c0_6] : memref<128x128xf32, #tpu.memory_space<vmem>>, vector<128x128xf32>
    tpu.vector_store %arg7[%c0_5, %c0_6], %10 {strides = array<i32>} : memref<128x128xf32, #tpu.memory_space<vmem>>, vector<128x128xf32>,
    %c0_i32_7 = arith.constant 0 : i32
    %12 = arith.cmpi eq, %arg1, %c0_i32_7 : i32
    %13 = arith.extui %12 : i1 to i32
    %c0_i32_8 = arith.constant 0 : i32
    %14 = arith.cmpi ne, %13, %c0_i32_8 : i32
    scf.if %14 {
      %c0_9 = arith.constant 0 : index
      %c0_10 = arith.constant 0 : index
      %15 = vector.load %arg7[%c0_9, %c0_10] : memref<128x128xf32, #tpu.memory_space<vmem>>, vector<128x128xf32>
      %c0_11 = arith.constant 0 : index
      %c0_12 = arith.constant 0 : index
      %16 = vector.load %arg4[%c0_11, %c0_12] : memref<1x128xf32, #tpu.memory_space<vmem>>, vector<1x128xf32>
      %17 = vector.broadcast %16 : vector<1x128xf32> to vector<128x128xf32>
      %18 = arith.addf %15, %17 : vector<128x128xf32>
      %cst_13 = arith.constant 0.000000e+00 : f32
      %19 = vector.broadcast %cst_13 : f32 to vector<128x128xf32>
      %20 = arith.maximumf %18, %19 : vector<128x128xf32>
      %21 = arith.truncf %20 : vector<128x128xf32> to vector<128x128xbf16>
      %c0_14 = arith.constant 0 : index
      %c0_15 = arith.constant 0 : index
      %22 = vector.load %arg5[%c0_14, %c0_15] : memref<128x128xbf16, #tpu.memory_space<vmem>>, vector<128x128xbf16>
      %cst_16 = arith.constant dense<0.000000e+00> : vector<128x128xf32>
      %23 = tpu.matmul %21, %22, %cst_16 {dimension_numbers = #tpu.dot_dimension_numbers<[1], [0], [0], [1], [0, 0, 1, 1], [], []>} : vector<128x128xbf16>, vector<128x128xbf16>, vector<128x128xf32> -> vector<128x128xf32>
      %24 = arith.truncf %23 : vector<128x128xf32> to vector<128x128xbf16>
      %c0_17 = arith.constant 0 : index
      %c0_18 = arith.constant 0 : index
      %25 = vector.load %arg6[%c0_17, %c0_18] : memref<128x128xbf16, #tpu.memory_space<vmem>>, vector<128x128xbf16>
      tpu.vector_store %arg6[%c0_17, %c0_18], %24 {strides = array<i32>} : memref<128x128xbf16, #tpu.memory_space<vmem>>, vector<128x128xbf16>,
    } else {
    }
    return
  }
  func.func @transform_0(%arg0: i32, %arg1: i32) -> (i32, i32) {
    %c0_i32 = arith.constant 0 : i32
    return %arg0, %arg1 : i32, i32
  }
  func.func @transform_1(%arg0: i32, %arg1: i32) -> (i32, i32) {
    %c0_i32 = arith.constant 0 : i32
    %c0_i32_0 = arith.constant 0 : i32
    %c0_i32_1 = arith.constant 0 : i32
    return %c0_i32, %c0_i32_0 : i32, i32
  }
  func.func @transform_2(%arg0: i32, %arg1: i32) -> (i32, i32) {
    %c0_i32 = arith.constant 0 : i32
    %c0_i32_0 = arith.constant 0 : i32
    %c0_i32_1 = arith.constant 0 : i32
    return %c0_i32, %c0_i32_0 : i32, i32
  }
  func.func @transform_3(%arg0: i32, %arg1: i32) -> (i32, i32) {
    %c0_i32 = arith.constant 0 : i32
    %c0_i32_0 = arith.constant 0 : i32
    %c0_i32_1 = arith.constant 0 : i32
    return %c0_i32, %c0_i32_0 : i32, i32
  }
  func.func @transform_4(%arg0: i32, %arg1: i32) -> (i32, i32) {
    %c0_i32 = arith.constant 0 : i32
    %c0_i32_0 = arith.constant 0 : i32
    return %arg0, %c0_i32 : i32, i32
  }
}

module attributes {stable_mosaic.version = 11 : i64} {
  func.func @propagate_fc_softmax_kernel(%arg0: i32, %arg1: i32, %arg2: memref<128x256xbf16, #tpu.memory_space<vmem>>, %arg3: memref<256x128xbf16, #tpu.memory_space<vmem>>, %arg4: memref<1x128xf32, #tpu.memory_space<vmem>>, %arg5: memref<128x128xbf16, #tpu.memory_space<vmem>>, %arg6: memref<1x128xf32, #tpu.memory_space<vmem>>, %arg7: memref<128x128xf32, #tpu.memory_space<vmem>>, %arg8: memref<128x128xf32, #tpu.memory_space<vmem>>) attributes {dimension_semantics = [#tpu.dimension_semantics<parallel>, #tpu.dimension_semantics<arbitrary>], iteration_bounds = array<i64: 2, 1>, scalar_prefetch = 0 : i64, scratch_operands = 1 : i64, tpu.core_type = #tpu.core_type<tc>, window_params = [{transform_indices = @transform_0, window_bounds = array<i64: 128, 256>}, {pipeline_mode = #tpu.pipeline_mode<synchronous>, transform_indices = @transform_1, window_bounds = array<i64: 256, 128>}, {pipeline_mode = #tpu.pipeline_mode<synchronous>, transform_indices = @transform_2, window_bounds = array<i64: 1, 128>}, {pipeline_mode = #tpu.pipeline_mode<synchronous>, transform_indices = @transform_3, window_bounds = array<i64: 128, 128>}, {pipeline_mode = #tpu.pipeline_mode<synchronous>, transform_indices = @transform_4, window_bounds = array<i64: 1, 128>}, {transform_indices = @transform_5, window_bounds = array<i64: 128, 128>}]} {
    %c0_i32 = arith.constant 0 : i32
    %0 = arith.cmpi eq, %arg1, %c0_i32 : i32
    %1 = arith.extui %0 : i1 to i32
    %c0_i32_0 = arith.constant 0 : i32
    %2 = arith.cmpi ne, %1, %c0_i32_0 : i32
    scf.if %2 {
      %cst_9 = arith.constant 0.000000e+00 : f32
      %15 = vector.broadcast %cst_9 : f32 to vector<128x128xf32>
      %c0_10 = arith.constant 0 : index
      %c0_11 = arith.constant 0 : index
      %16 = vector.load %arg8[%c0_10, %c0_11] : memref<128x128xf32, #tpu.memory_space<vmem>>, vector<128x128xf32>
      tpu.vector_store %arg8[%c0_10, %c0_11], %15 {strides = array<i32>} : memref<128x128xf32, #tpu.memory_space<vmem>>, vector<128x128xf32>,
    } else {
    }
    %c256_i32 = arith.constant 256 : i32
    %3 = arith.muli %arg1, %c256_i32 : i32
    %4 = tpu.assume_multiple %3, 128 : i32
    %5 = arith.index_cast %4 : i32 to index
    %c0 = arith.constant 0 : index
    %6 = vector.load %arg3[%5, %c0] : memref<256x128xbf16, #tpu.memory_space<vmem>>, vector<256x128xbf16>
    %c0_1 = arith.constant 0 : index
    %c0_2 = arith.constant 0 : index
    %7 = vector.load %arg8[%c0_1, %c0_2] : memref<128x128xf32, #tpu.memory_space<vmem>>, vector<128x128xf32>
    %c0_3 = arith.constant 0 : index
    %c0_4 = arith.constant 0 : index
    %8 = vector.load %arg2[%c0_3, %c0_4] : memref<128x256xbf16, #tpu.memory_space<vmem>>, vector<128x256xbf16>
    %cst = arith.constant dense<0.000000e+00> : vector<128x128xf32>
    %9 = tpu.matmul %8, %6, %cst {dimension_numbers = #tpu.dot_dimension_numbers<[1], [0], [0], [1], [0, 0, 1, 1], [], []>} : vector<128x256xbf16>, vector<256x128xbf16>, vector<128x128xf32> -> vector<128x128xf32>
    %10 = arith.addf %7, %9 : vector<128x128xf32>
    %c0_5 = arith.constant 0 : index
    %c0_6 = arith.constant 0 : index
    %11 = vector.load %arg8[%c0_5, %c0_6] : memref<128x128xf32, #tpu.memory_space<vmem>>, vector<128x128xf32>
    tpu.vector_store %arg8[%c0_5, %c0_6], %10 {strides = array<i32>} : memref<128x128xf32, #tpu.memory_space<vmem>>, vector<128x128xf32>,
    %c0_i32_7 = arith.constant 0 : i32
    %12 = arith.cmpi eq, %arg1, %c0_i32_7 : i32
    %13 = arith.extui %12 : i1 to i32
    %c0_i32_8 = arith.constant 0 : i32
    %14 = arith.cmpi ne, %13, %c0_i32_8 : i32
    scf.if %14 {
      %c0_9 = arith.constant 0 : index
      %c0_10 = arith.constant 0 : index
      %15 = vector.load %arg8[%c0_9, %c0_10] : memref<128x128xf32, #tpu.memory_space<vmem>>, vector<128x128xf32>
      %c0_11 = arith.constant 0 : index
      %c0_12 = arith.constant 0 : index
      %16 = vector.load %arg4[%c0_11, %c0_12] : memref<1x128xf32, #tpu.memory_space<vmem>>, vector<1x128xf32>
      %17 = vector.broadcast %16 : vector<1x128xf32> to vector<128x128xf32>
      %18 = arith.addf %15, %17 : vector<128x128xf32>
      %cst_13 = arith.constant 0.000000e+00 : f32
      %19 = vector.broadcast %cst_13 : f32 to vector<128x128xf32>
      %20 = arith.maximumf %18, %19 : vector<128x128xf32>
      %21 = arith.truncf %20 : vector<128x128xf32> to vector<128x128xbf16>
      %c0_14 = arith.constant 0 : index
      %c0_15 = arith.constant 0 : index
      %22 = vector.load %arg5[%c0_14, %c0_15] : memref<128x128xbf16, #tpu.memory_space<vmem>>, vector<128x128xbf16>
      %cst_16 = arith.constant dense<0.000000e+00> : vector<128x128xf32>
      %23 = tpu.matmul %21, %22, %cst_16 {dimension_numbers = #tpu.dot_dimension_numbers<[1], [0], [0], [1], [0, 0, 1, 1], [], []>} : vector<128x128xbf16>, vector<128x128xbf16>, vector<128x128xf32> -> vector<128x128xf32>
      %c0_17 = arith.constant 0 : index
      %c0_18 = arith.constant 0 : index
      %24 = vector.load %arg6[%c0_17, %c0_18] : memref<1x128xf32, #tpu.memory_space<vmem>>, vector<1x128xf32>
      %25 = vector.broadcast %24 : vector<1x128xf32> to vector<128x128xf32>
      %26 = arith.addf %23, %25 : vector<128x128xf32>
      %cst_19 = arith.constant dense<0xFF800000> : vector<128xf32>
      %27 = vector.multi_reduction <maximumf>, %26, %cst_19 [1] : vector<128x128xf32> to vector<128xf32>
      %28 = vector.shape_cast %27 : vector<128xf32> to vector<128x1xf32>
      %29 = vector.broadcast %28 : vector<128x1xf32> to vector<128x128xf32>
      %30 = arith.subf %26, %29 : vector<128x128xf32>
      %31 = math.exp %30 : vector<128x128xf32>
      %cst_20 = arith.constant dense<0.000000e+00> : vector<128xf32>
      %32 = vector.multi_reduction <add>, %31, %cst_20 [1] : vector<128x128xf32> to vector<128xf32>
      %33 = vector.shape_cast %32 : vector<128xf32> to vector<128x1xf32>
      %34 = tpu.reciprocal %33 : vector<128x1xf32> -> vector<128x1xf32>
      %35 = vector.broadcast %34 : vector<128x1xf32> to vector<128x128xf32>
      %36 = arith.mulf %31, %35 : vector<128x128xf32>
      %c0_21 = arith.constant 0 : index
      %c0_22 = arith.constant 0 : index
      %37 = vector.load %arg7[%c0_21, %c0_22] : memref<128x128xf32, #tpu.memory_space<vmem>>, vector<128x128xf32>
      tpu.vector_store %arg7[%c0_21, %c0_22], %36 {strides = array<i32>} : memref<128x128xf32, #tpu.memory_space<vmem>>, vector<128x128xf32>,
    } else {
    }
    return
  }
  func.func @transform_0(%arg0: i32, %arg1: i32) -> (i32, i32) {
    %c0_i32 = arith.constant 0 : i32
    return %arg0, %arg1 : i32, i32
  }
  func.func @transform_1(%arg0: i32, %arg1: i32) -> (i32, i32) {
    %c0_i32 = arith.constant 0 : i32
    %c0_i32_0 = arith.constant 0 : i32
    %c0_i32_1 = arith.constant 0 : i32
    return %c0_i32, %c0_i32_0 : i32, i32
  }
  func.func @transform_2(%arg0: i32, %arg1: i32) -> (i32, i32) {
    %c0_i32 = arith.constant 0 : i32
    %c0_i32_0 = arith.constant 0 : i32
    %c0_i32_1 = arith.constant 0 : i32
    return %c0_i32, %c0_i32_0 : i32, i32
  }
  func.func @transform_3(%arg0: i32, %arg1: i32) -> (i32, i32) {
    %c0_i32 = arith.constant 0 : i32
    %c0_i32_0 = arith.constant 0 : i32
    %c0_i32_1 = arith.constant 0 : i32
    return %c0_i32, %c0_i32_0 : i32, i32
  }
  func.func @transform_4(%arg0: i32, %arg1: i32) -> (i32, i32) {
    %c0_i32 = arith.constant 0 : i32
    %c0_i32_0 = arith.constant 0 : i32
    %c0_i32_1 = arith.constant 0 : i32
    return %c0_i32, %c0_i32_0 : i32, i32
  }
  func.func @transform_5(%arg0: i32, %arg1: i32) -> (i32, i32) {
    %c0_i32 = arith.constant 0 : i32
    %c0_i32_0 = arith.constant 0 : i32
    return %arg0, %c0_i32 : i32, i32
  }
}

</mosaic_0001>

<bundles_post_ra>
// kernel: gnn_classifier_forward.3
= control target key start
LH: loop header
LB: loop body
LE: loop exit
PB: predicated region body
PF: predicated region fallthrough
CT: control target
= control target key end

     0   :  { %s726_s9 = smov 0   ;;  %s784_s0 = inlined_call_operand.vmem [shape: bf16[256,128], index: 0, kind: input, shape index: {}]   ;;  %s785_s1 = inlined_call_operand.vmem [shape: bf16[128,128], index: 1, kind: input, shape index: {}]   ;;  %s786_s2 = inlined_call_operand.vmem [shape: bf16[256,128], index: 2, kind: output, shape index: {}]  }
   0x1 LB: > { %s509_s10 = sadd.s32 4294967295, %s709_s9   ;;  %p513_p0 = scmp.ge.s32.totalorder %s709_s9, 1  ;;  %s709_s9 = sphi %s726_s9, %s12_s9  }
   0x2   : > { %p113_p1 = scmp.lt.s32.totalorder %s709_s9, 3 }
   0x4   : > { %p114_p2 = pnand %p513_p0, %p113_p1 }
   0x5   : > { %s514_s13 = sshll.u32 (!%p114_p2), %s509_s10, 4 }
   0x6   : > { %117 = sbr.rel (%p114_p2) target bundleno = 254 (0xfe), region = 28  ;;  %p136_p3 = scmp.lt.s32.totalorder (!%p114_p2), %s514_s13, 31 }
   0xb   : > { %v687_v0 = vld [vmem:[%s785_s1 + $0x38] sm:$0xff]   ;;  %v688_v1 = vld [vmem:[%s785_s1 + $0x30] sm:$0xff]   ;;  %s788_s13 = smov (!%p136_p3, %s514_s13), 31  ;;  %v689_v2 = vld [vmem:[%s785_s1 + $0x28] sm:$0xff]  }
   0xc   : > { %631 = vmatprep.subr.bf16.mxu0 %v687_v0  ;;  %663 = vmatprep.subr.bf16.mxu1 %v687_v0  ;;  %s515_s18 = sshll.u32 %s788_s13, 2  ;;  %v690_v3 = vld [vmem:[%s785_s1 + $0x20] sm:$0xff]   ;;  %v691_v6 = vld [vmem:[%s785_s1 + $0x18] sm:$0xff]   ;;  %v692_v7 = vld [vmem:[%s785_s1 + $0x10] sm:$0xff]  }
   0xd   : > { %632 = vmatpush3.bf16.msra.mxu0 %v687_v0  ;;  %671 = vmatpush3.bf16.msra.mxu1 %v687_v0  ;;  %s751_s21 = scalar_lea.vmem %s784_s0, %s515_s18  ;;  %v693_v8 = vld [vmem:[%s785_s1 + $0x8] sm:$0xff]   ;;  %v694_v9 = vld [vmem:[%s785_s1] sm:$0xff]   ;;  %s145_s6 = scalar_lea.vmem %s786_s2, %s515_s18 }
   0xe   : > { %633 = vmatprep.subr.bf16.mxu0 %v688_v1  ;;  %664 = vmatprep.subr.bf16.mxu1 %v688_v1  ;;  %v695_v4 = vld [vmem:[%s751_s21] sm:$0xff]   ;;  %v697_v10 = vld [vmem:[%s751_s21 + $0x8] sm:$0xff]   ;;  %v699_v12 = vld [vmem:[%s751_s21 + $0x10] sm:$0xff]  }
   0xf   : > { %v696_v5 = vld [vmem:[%s751_s21 + $0x20] sm:$0xff]   ;;  %647 = vmatprep.mubr.bf16.mxu0 %v695_v4  ;;  %v698_v11 = vld [vmem:[%s751_s21 + $0x28] sm:$0xff]   ;;  %v700_v13 = vld [vmem:[%s751_s21 + $0x30] sm:$0xff]  }
  0x10   : > { %655 = vmatprep.mubr.bf16.mxu1 %v696_v5  ;;  %v701_v14 = vld [vmem:[%s751_s21 + $0x18] sm:$0xff]  }
  0x11   : > { %634 = vmatpush3.bf16.msra.mxu0 %v688_v1  ;;  %672 = vmatpush3.bf16.msra.mxu1 %v688_v1  ;;  %v702_v15 = vld [vmem:[%s751_s21 + $0x38] sm:$0xff]  }
  0x12   : > { %635 = vmatprep.subr.bf16.mxu0 %v689_v2  ;;  %665 = vmatprep.subr.bf16.mxu1 %v689_v2 }
  0x15   : > { %636 = vmatpush3.bf16.msra.mxu0 %v689_v2  ;;  %673 = vmatpush3.bf16.msra.mxu1 %v689_v2 }
  0x16   : > { %637 = vmatprep.subr.bf16.mxu0 %v690_v3  ;;  %666 = vmatprep.subr.bf16.mxu1 %v690_v3 }
  0x19   : > { %638 = vmatpush3.bf16.msra.mxu0 %v690_v3  ;;  %674 = vmatpush3.bf16.msra.mxu1 %v690_v3 }
  0x1a   : > { %639 = vmatprep.subr.bf16.mxu0 %v691_v6  ;;  %667 = vmatprep.subr.bf16.mxu1 %v691_v6 }
  0x1d   : > { %640 = vmatpush3.bf16.msra.mxu0 %v691_v6  ;;  %675 = vmatpush3.bf16.msra.mxu1 %v691_v6 }
  0x1e   : > { %641 = vmatprep.subr.bf16.mxu0 %v692_v7  ;;  %668 = vmatprep.subr.bf16.mxu1 %v692_v7 }
  0x21   : > { %642 = vmatpush3.bf16.msra.mxu0 %v692_v7  ;;  %676 = vmatpush3.bf16.msra.mxu1 %v692_v7 }
  0x22   : > { %643 = vmatprep.subr.bf16.mxu0 %v693_v8  ;;  %669 = vmatprep.subr.bf16.mxu1 %v693_v8 }
  0x25   : > { %644 = vmatpush3.bf16.msra.mxu0 %v693_v8  ;;  %677 = vmatpush3.bf16.msra.mxu1 %v693_v8 }
  0x26   : > { %645 = vmatprep.subr.bf16.mxu0 %v694_v9  ;;  %670 = vmatprep.subr.bf16.mxu1 %v694_v9 }
  0x29   : > { %646 = vmatpush3.bf16.msra.mxu0 %v694_v9  ;;  %678 = vmatpush3.bf16.msra.mxu1 %v694_v9 }
  0x2c   : > { %648 = vmatmul.mubr.bf16.vlgmr.msra.gmra.mxu0 %v697_v10  ;;  %656 = vmatmul.mubr.bf16.vlgmr.msra.gmra.mxu1 %v698_v11 }
  0x2d   : > { %651 = vmatprep.mubr.bf16.mxu0 %v699_v12  ;;  %659 = vmatprep.mubr.bf16.mxu1 %v700_v13 }
  0x34   : > { %652 = vmatmul.mubr.bf16.gmra.mxu0 %v701_v14  ;;  %660 = vmatmul.mubr.bf16.gmra.mxu1 %v702_v15 }
  0xec   : > { %v649_v16 = vpop.f32.mrf.mxu0  ;;  %v657_v17 = vpop.f32.mrf.mxu1 }
  0xee   : > { %v310_v18 = vpop.f32.mrf.mxu0  ;;  %v342_v19 = vpop.f32.mrf.mxu1 }
  0xf0   : > { %v650_v20 = vpop.f32.mrf.mxu0  ;;  %v658_v21 = vpop.f32.mrf.mxu1 }
  0xf1   : > { %v576_v22 = vpack.c.bf16 %v650_v20, %v649_v16  ;;  %v596_v23 = vpack.c.bf16 %v658_v21, %v657_v17 }
  0xf2   : > { %v313_v24 = vpop.f32.mrf.mxu0  ;;  %v345_v25 = vpop.f32.mrf.mxu1 }
  0xf3   : > { %608 = vst [vmem:[%s145_s6 + $0x8] sm:$0xff] %v576_v22   ;;  %612 = vst [vmem:[%s145_s6 + $0x28] sm:$0xff] %v596_v23   ;;  %v571_v26 = vpack.c.bf16 %v313_v24, %v310_v18  ;;  %v591_v27 = vpack.c.bf16 %v345_v25, %v342_v19 }
  0xf4   : > { %v653_v28 = vpop.f32.mrf.mxu0  ;;  %v661_v29 = vpop.f32.mrf.mxu1 }
  0xf5   : > { %572 = vst [vmem:[%s145_s6] sm:$0xff] %v571_v26   ;;  %611 = vst [vmem:[%s145_s6 + $0x20] sm:$0xff] %v591_v27  }
  0xf6   : > { %v326_v30 = vpop.f32.mrf.mxu0  ;;  %v358_v31 = vpop.f32.mrf.mxu1 }
  0xf8   : > { %v654_v32 = vpop.f32.mrf.mxu0  ;;  %v662_v33 = vpop.f32.mrf.mxu1 }
  0xf9   : > { %v586_v34 = vpack.c.bf16 %v654_v32, %v653_v28  ;;  %v606_v35 = vpack.c.bf16 %v662_v33, %v661_v29 }
  0xfa   : > { %v329_v36 = vpop.f32.mrf.mxu0  ;;  %v361_v37 = vpop.f32.mrf.mxu1 }
  0xfb   : > { %610 = vst [vmem:[%s145_s6 + $0x18] sm:$0xff] %v586_v34   ;;  %614 = vst [vmem:[%s145_s6 + $0x38] sm:$0xff] %v606_v35   ;;  %v581_v38 = vpack.c.bf16 %v329_v36, %v326_v30  ;;  %v601_v39 = vpack.c.bf16 %v361_v37, %v358_v31 }
  0xfd   : > { %609 = vst [vmem:[%s145_s6 + $0x10] sm:$0xff] %v581_v38   ;;  %613 = vst [vmem:[%s145_s6 + $0x30] sm:$0xff] %v601_v39  }
  0xfe PF: > { %s12_s9 = sadd.s32 1, %s709_s9  }
  0xff   : > { %p9_p4 = scmp.ge.s32.totalorder %s12_s9, 4  }
 0x101   :  { %11 = sbr.rel (!%p9_p4) target bundleno = 1 (0x1), region = 58 }

// kernel: gnn_classifier_forward.4
= control target key start
LH: loop header
LB: loop body
LE: loop exit
PB: predicated region body
PF: predicated region fallthrough
CT: control target
= control target key end

     0   :  { %s1373_s15 = smov 0   ;;  %s1375_s16 = smov 0   ;;  %s1521_s0 = inlined_call_operand.vmem [shape: bf16[256,256], index: 0, kind: input, shape index: {}]   ;;  %s1522_s1 = inlined_call_operand.vmem [shape: bf16[256,128], index: 1, kind: input, shape index: {}]   ;;  %s1523_s2 = inlined_call_operand.vmem [shape: f32[1,128], index: 2, kind: input, shape index: {}]   ;;  %s1524_s3 = inlined_call_operand.vmem [shape: bf16[128,128], index: 3, kind: input, shape index: {}]   ;;  %s1525_s4 = inlined_call_operand.vmem [shape: bf16[256,128], index: 4, kind: output, shape index: {}]  }
   0x1   :  { %s1377_s17 = smov 0  }
   0x2 LB: > { %s26_s18 = sadd.s32 1, %s1342_s16  ;;  %p1011_p0 = scmp.ge.s32.totalorder %s1346_s17, 1  ;;  %s1346_s17 = sphi %s1377_s17, %s14_s17   ;;  %s1342_s16 = sphi %s1375_s16, %s1527_s16   ;;  %s1338_s15 = sphi %s1373_s15, %s1526_s15  }
   0x3   : > { %p28_p1 = scmp.ge.s32.totalorder %s26_s18, 2  ;;  %p183_p2 = scmp.lt.s32.totalorder %s1346_s17, 3 }
   0x5   : > { %s1529_s18 = smov (%p28_p1, %s26_s18), 0  ;;  %p184_p3 = pnand %p1011_p0, %p183_p2 }
   0x6   : > { %s1012_s21 = sshll.u32 (!%p184_p3), %s1338_s15, 4 }
   0x7   : > { %187 = sbr.rel (%p184_p3) target bundleno = 510 (0x1fe), region = 36  ;;  %p216_p4 = scmp.lt.s32.totalorder (!%p184_p3), %s1012_s21, 31 }
   0xc   : > { %v1276_v0 = vld [vmem:[%s1522_s1 + $0x78] sm:$0xff]   ;;  %v1278_v2 = vld [vmem:[%s1522_s1 + $0x70] sm:$0xff]   ;;  %v1280_v4 = vld [vmem:[%s1522_s1 + $0x68] sm:$0xff]   ;;  %s1531_s21 = smov (!%p216_p4, %s1012_s21), 31 }
   0xd   : > { %v1277_v1 = vld [vmem:[%s1522_s1 + $0x38] sm:$0xff]   ;;  %1140 = vmatprep.subr.bf16.mxu0 %v1276_v0  ;;  %v1279_v3 = vld [vmem:[%s1522_s1 + $0x30] sm:$0xff]   ;;  %v1281_v5 = vld [vmem:[%s1522_s1 + $0x28] sm:$0xff]   ;;  %s1076_s10 = sshll.u32 %s1531_s21, 3  ;;  %s1016_s30 = sshll.u32 %s1531_s21, 2 }
   0xe   : > { %1141 = vmatpush3.bf16.msra.mxu0 %v1277_v1  ;;  %v1282_v6 = vld [vmem:[%s1522_s1 + $0x60] sm:$0xff]   ;;  %v1284_v8 = vld [vmem:[%s1522_s1 + $0x58] sm:$0xff]   ;;  %s1424_s15 = scalar_lea.vmem %s1521_s0, %s1076_s10  ;;  %v1286_v10 = vld [vmem:[%s1522_s1 + $0x50] sm:$0xff]   ;;  %s230_s7 = scalar_lea.vmem %s1525_s4, %s1016_s30 }
   0xf   : > { %1142 = vmatprep.subr.bf16.mxu0 %v1278_v2  ;;  %v1283_v7 = vld [vmem:[%s1522_s1 + $0x20] sm:$0xff]   ;;  %v1285_v9 = vld [vmem:[%s1522_s1 + $0x18] sm:$0xff]   ;;  %v1287_v12 = vld [vmem:[%s1522_s1 + $0x10] sm:$0xff]  }
  0x10   : > { %v1294_v11 = vld [vmem:[%s1424_s15 + $0x4] ss:$8 sps:$4 sm:$0xff]   ;;  %v1316_v17 = vld [vmem:[%s1524_s3 + $0x38] sm:$0xff]   ;;  %v1292_v18 = vld [vmem:[%s1424_s15] ss:$8 sps:$4 sm:$0xff]  }
  0x11   : > { %530 = vmatprep.mubr.bf16.mxu0 %v1294_v11  ;;  %v1288_v13 = vld [vmem:[%s1522_s1 + $0x48] sm:$0xff]   ;;  %v1290_v15 = vld [vmem:[%s1522_s1 + $0x40] sm:$0xff]   ;;  %v1317_v19 = vld [vmem:[%s1524_s3 + $0x30] sm:$0xff]   ;;  %1220 = vmatprep.subr.bf16.mxu1 %v1316_v17 }
  0x12   : > { %1143 = vmatpush3.bf16.msra.mxu0 %v1279_v3  ;;  %v1289_v14 = vld [vmem:[%s1522_s1 + $0x8] sm:$0xff]   ;;  %v1291_v16 = vld [vmem:[%s1522_s1] sm:$0xff]   ;;  %v1295_v20 = vld [vmem:[%s1424_s15 + $0x14] ss:$8 sps:$4 sm:$0xff]   ;;  %1221 = vmatpush3.bf16.msra.mxu1 %v1316_v17 }
  0x13   : > { %1144 = vmatprep.subr.bf16.mxu0 %v1280_v4  ;;  %v1318_v21 = vld [vmem:[%s1524_s3 + $0x28] sm:$0xff]   ;;  %1222 = vmatprep.subr.bf16.mxu1 %v1317_v19  ;;  %v1297_v22 = vld [vmem:[%s1424_s15 + $0x10] ss:$8 sps:$4 sm:$0xff]   ;;  %v1301_v25 = vld [vmem:[%s1424_s15 + $0x34] ss:$8 sps:$4 sm:$0xff]  }
  0x14   : > { %v1298_v23 = vld [vmem:[%s1424_s15 + $0x24] ss:$8 sps:$4 sm:$0xff]   ;;  %v1300_v24 = vld [vmem:[%s1424_s15 + $0x20] ss:$8 sps:$4 sm:$0xff]   ;;  %v1303_v26 = vld [vmem:[%s1424_s15 + $0x30] ss:$8 sps:$4 sm:$0xff]  }
  0x15   : > { %v1304_v27 = vld [vmem:[%s1424_s15 + $0x44] ss:$8 sps:$4 sm:$0xff]   ;;  %v1306_v28 = vld [vmem:[%s1424_s15 + $0x40] ss:$8 sps:$4 sm:$0xff]   ;;  %v1307_v29 = vld [vmem:[%s1424_s15 + $0x54] ss:$8 sps:$4 sm:$0xff]  }
  0x16   : > { %1145 = vmatpush3.bf16.msra.mxu0 %v1281_v5  ;;  %1223 = vmatpush3.bf16.msra.mxu1 %v1317_v19  ;;  %v1309_v30 = vld [vmem:[%s1424_s15 + $0x50] ss:$8 sps:$4 sm:$0xff]   ;;  %v1310_v31 = vld [vmem:[%s1424_s15 + $0x64] ss:$8 sps:$4 sm:$0xff]   ;;  %v1312_v32 = vld [vmem:[%s1424_s15 + $0x60] ss:$8 sps:$4 sm:$0xff]  }
  0x17   : > { %1146 = vmatprep.subr.bf16.mxu0 %v1282_v6  ;;  %1224 = vmatprep.subr.bf16.mxu1 %v1318_v21  ;;  %v1313_v33 = vld [vmem:[%s1424_s15 + $0x74] ss:$8 sps:$4 sm:$0xff]   ;;  %v1315_v34 = vld [vmem:[%s1424_s15 + $0x70] ss:$8 sps:$4 sm:$0xff]   ;;  %v1319_v35 = vld [vmem:[%s1524_s3 + $0x20] sm:$0xff]  }
  0x18   : > { %v1320_v36 = vld [vmem:[%s1524_s3 + $0x18] sm:$0xff]   ;;  %v1321_v37 = vld [vmem:[%s1524_s3 + $0x10] sm:$0xff]   ;;  %v1322_v38 = vld [vmem:[%s1524_s3 + $0x8] sm:$0xff]  }
  0x19   : > { %v1323_v39 = vld [vmem:[%s1524_s3] sm:$0xff]  }
  0x1a   : > { %1147 = vmatpush3.bf16.msra.mxu0 %v1283_v7  ;;  %1225 = vmatpush3.bf16.msra.mxu1 %v1318_v21  ;;  %v1490_v44 = vld [vmem:[%s1523_s2] ss:$0 sm:$0xff] }
  0x1b   : > { %1148 = vmatprep.subr.bf16.mxu0 %v1284_v8  ;;  %1226 = vmatprep.subr.bf16.mxu1 %v1319_v35 }
  0x1e   : > { %1149 = vmatpush3.bf16.msra.mxu0 %v1285_v9  ;;  %1227 = vmatpush3.bf16.msra.mxu1 %v1319_v35 }
  0x1f   : > { %1150 = vmatprep.subr.bf16.mxu0 %v1286_v10  ;;  %1228 = vmatprep.subr.bf16.mxu1 %v1320_v36 }
  0x22   : > { %1151 = vmatpush3.bf16.msra.mxu0 %v1287_v12  ;;  %1229 = vmatpush3.bf16.msra.mxu1 %v1320_v36 }
  0x23   : > { %1152 = vmatprep.subr.bf16.mxu0 %v1288_v13  ;;  %1230 = vmatprep.subr.bf16.mxu1 %v1321_v37 }
  0x26   : > { %1153 = vmatpush3.bf16.msra.mxu0 %v1289_v14  ;;  %1231 = vmatpush3.bf16.msra.mxu1 %v1321_v37 }
  0x27   : > { %1154 = vmatprep.subr.bf16.mxu0 %v1290_v15  ;;  %1232 = vmatprep.subr.bf16.mxu1 %v1322_v38 }
  0x2a   : > { %1155 = vmatpush3.bf16.msra.mxu0 %v1291_v16  ;;  %1233 = vmatpush3.bf16.msra.mxu1 %v1322_v38 }
  0x2b   : > { %1234 = vmatprep.subr.bf16.mxu1 %v1323_v39 }
  0x2d   : > { %531 = vmatmul.mubr.bf16.vlgmr.msra.gmra.mxu0 %v1292_v18 }
  0x2e   : > { %538 = vmatprep.mubr.bf16.mxu0 %v1295_v20  ;;  %1235 = vmatpush3.bf16.msra.mxu1 %v1323_v39 }
  0x35   : > { %539 = vmatmul.mubr.bf16.gmra.mxu0 %v1297_v22 }
  0x36   : > { %546 = vmatprep.mubr.bf16.mxu0 %v1298_v23 }
  0x3d   : > { %547 = vmatmul.mubr.bf16.gmra.mxu0 %v1300_v24 }
  0x3e   : > { %554 = vmatprep.mubr.bf16.mxu0 %v1301_v25 }
  0x45   : > { %555 = vmatmul.mubr.bf16.gmra.mxu0 %v1303_v26 }
  0x46   : > { %562 = vmatprep.mubr.bf16.mxu0 %v1304_v27 }
  0x4d   : > { %563 = vmatmul.mubr.bf16.gmra.mxu0 %v1306_v28 }
  0x4e   : > { %570 = vmatprep.mubr.bf16.mxu0 %v1307_v29 }
  0x55   : > { %571 = vmatmul.mubr.bf16.gmra.mxu0 %v1309_v30 }
  0x56   : > { %578 = vmatprep.mubr.bf16.mxu0 %v1310_v31 }
  0x5d   : > { %579 = vmatmul.mubr.bf16.gmra.mxu0 %v1312_v32 }
  0x5e   : > { %586 = vmatprep.mubr.bf16.mxu0 %v1313_v33 }
  0x65   : > { %587 = vmatmul.mubr.bf16.gmra.mxu0 %v1315_v34 }
  0xed   : > { %v1156_v40 = vpop.f32.mrf.mxu0 }
  0xef   : > { %v1157_v41 = vpop.f32.mrf.mxu0 }
  0xf0   : > { %v1158_v42 = vadd.f32 %v1157_v41, %v1156_v40 }
  0xf1   : > { %v1159_v43 = vpop.f32.mrf.mxu0 }
  0xf2   : > { %v653_v47 = vadd.f32 %v1158_v42, %v1490_v44 }
  0xf3   : > { %v1160_v45 = vpop.f32.mrf.mxu0 }
  0xf4   : > { %v1161_v46 = vadd.f32 %v1160_v45, %v1159_v43  ;;  %v669_v52 = vmax.f32 %v653_v47, 0.0 }
  0xf5   : > { %v1162_v48 = vpop.f32.mrf.mxu0 }
  0xf6   : > { %v654_v49 = vadd.f32 %v1161_v46, %v1490_v44 }
  0xf7   : > { %v1163_v50 = vpop.f32.mrf.mxu0 }
  0xf8   : > { %v1164_v51 = vadd.f32 %v1163_v50, %v1162_v48  ;;  %v670_v53 = vmax.f32 %v654_v49, 0.0 }
  0xf9   : > { %v1165_v54 = vpop.f32.mrf.mxu0 }
  0xfa   : > { %v685_v55 = vpack.c.bf16 %v670_v53, %v669_v52  ;;  %v655_v57 = vadd.f32 %v1164_v51, %v1490_v44 }
  0xfb   : > { %v1166_v56 = vpop.f32.mrf.mxu0 }
  0xfc   : > { %v1167_v58 = vadd.f32 %v1166_v56, %v1165_v54  ;;  %1236 = vmatprep.mubr.bf16.mxu1 %v685_v55  ;;  %v671_v62 = vmax.f32 %v655_v57, 0.0 }
  0xfd   : > { %v1168_v59 = vpop.f32.mrf.mxu0 }
  0xfe   : > { %v656_v60 = vadd.f32 %v1167_v58, %v1490_v44 }
  0xff   : > { %v1169_v61 = vpop.f32.mrf.mxu0 }
 0x100   : > { %v672_v63 = vmax.f32 %v656_v60, 0.0  ;;  %v1170_v0 = vadd.f32 %v1169_v61, %v1168_v59 }
 0x101   : > { %v1171_v1 = vpop.f32.mrf.mxu0 }
 0x102   : > { %v686_v2 = vpack.c.bf16 %v672_v63, %v671_v62  ;;  %v657_v4 = vadd.f32 %v1170_v0, %v1490_v44 }
 0x103   : > { %v1172_v3 = vpop.f32.mrf.mxu0 }
 0x104   : > { %v1173_v5 = vadd.f32 %v1172_v3, %v1171_v1  ;;  %1237 = vmatmul.mubr.bf16.vlgmr.msra.gmra.mxu1 %v686_v2  ;;  %v673_v9 = vmax.f32 %v657_v4, 0.0 }
 0x105   : > { %v1174_v6 = vpop.f32.mrf.mxu0 }
 0x106   : > { %v658_v7 = vadd.f32 %v1173_v5, %v1490_v44 }
 0x107   : > { %v1175_v8 = vpop.f32.mrf.mxu0 }
 0x108   : > { %v674_v10 = vmax.f32 %v658_v7, 0.0  ;;  %v1176_v11 = vadd.f32 %v1175_v8, %v1174_v6 }
 0x109   : > { %v1177_v12 = vpop.f32.mrf.mxu0 }
 0x10a   : > { %v687_v13 = vpack.c.bf16 %v674_v10, %v673_v9  ;;  %v659_v15 = vadd.f32 %v1176_v11, %v1490_v44 }
 0x10b   : > { %v1178_v14 = vpop.f32.mrf.mxu0 }
 0x10c   : > { %v1179_v16 = vadd.f32 %v1178_v14, %v1177_v12  ;;  %1240 = vmatprep.mubr.bf16.mxu1 %v687_v13  ;;  %v675_v20 = vmax.f32 %v659_v15, 0.0 }
 0x10d   : > { %v1180_v17 = vpop.f32.mrf.mxu0 }
 0x10e   : > { %v660_v18 = vadd.f32 %v1179_v16, %v1490_v44 }
 0x10f   : > { %v1181_v19 = vpop.f32.mrf.mxu0 }
 0x110   : > { %v676_v21 = vmax.f32 %v660_v18, 0.0  ;;  %v1182_v22 = vadd.f32 %v1181_v19, %v1180_v17 }
 0x111   : > { %v1183_v23 = vpop.f32.mrf.mxu0 }
 0x112   : > { %v688_v24 = vpack.c.bf16 %v676_v21, %v675_v20  ;;  %v661_v26 = vadd.f32 %v1182_v22, %v1490_v44 }
 0x113   : > { %v1184_v25 = vpop.f32.mrf.mxu0 }
 0x114   : > { %v1185_v27 = vadd.f32 %v1184_v25, %v1183_v23  ;;  %1241 = vmatmul.mubr.bf16.gmra.mxu1 %v688_v24  ;;  %v677_v31 = vmax.f32 %v661_v26, 0.0 }
 0x115   : > { %v1186_v28 = vpop.f32.mrf.mxu0 }
 0x116   : > { %v662_v29 = vadd.f32 %v1185_v27, %v1490_v44 }
 0x117   : > { %v1187_v30 = vpop.f32.mrf.mxu0 }
 0x118   : > { %v678_v32 = vmax.f32 %v662_v29, 0.0  ;;  %v1188_v33 = vadd.f32 %v1187_v30, %v1186_v28 }
 0x119   : > { %v1189_v34 = vpop.f32.mrf.mxu0 }
 0x11a   : > { %v689_v35 = vpack.c.bf16 %v678_v32, %v677_v31  ;;  %v663_v37 = vadd.f32 %v1188_v33, %v1490_v44 }
 0x11b   : > { %v1190_v36 = vpop.f32.mrf.mxu0 }
 0x11c   : > { %v1191_v38 = vadd.f32 %v1190_v36, %v1189_v34  ;;  %1244 = vmatprep.mubr.bf16.mxu1 %v689_v35  ;;  %v679_v42 = vmax.f32 %v663_v37, 0.0 }
 0x11d   : > { %v1192_v39 = vpop.f32.mrf.mxu0 }
 0x11e   : > { %v664_v40 = vadd.f32 %v1191_v38, %v1490_v44 }
 0x11f   : > { %v1193_v41 = vpop.f32.mrf.mxu0 }
 0x120   : > { %v680_v43 = vmax.f32 %v664_v40, 0.0  ;;  %v1194_v45 = vadd.f32 %v1193_v41, %v1192_v39 }
 0x121   : > { %v1195_v46 = vpop.f32.mrf.mxu0 }
 0x122   : > { %v690_v47 = vpack.c.bf16 %v680_v43, %v679_v42  ;;  %v665_v49 = vadd.f32 %v1194_v45, %v1490_v44 }
 0x123   : > { %v1196_v48 = vpop.f32.mrf.mxu0 }
 0x124   : > { %v1197_v50 = vadd.f32 %v1196_v48, %v1195_v46  ;;  %1245 = vmatmul.mubr.bf16.gmra.mxu1 %v690_v47  ;;  %v681_v54 = vmax.f32 %v665_v49, 0.0 }
 0x125   : > { %v1198_v51 = vpop.f32.mrf.mxu0 }
 0x126   : > { %v666_v52 = vadd.f32 %v1197_v50, %v1490_v44 }
 0x127   : > { %v1199_v53 = vpop.f32.mrf.mxu0 }
 0x128   : > { %v682_v55 = vmax.f32 %v666_v52, 0.0  ;;  %v1200_v56 = vadd.f32 %v1199_v53, %v1198_v51 }
 0x129   : > { %v1201_v57 = vpop.f32.mrf.mxu0 }
 0x12a   : > { %v691_v58 = vpack.c.bf16 %v682_v55, %v681_v54  ;;  %v667_v60 = vadd.f32 %v1200_v56, %v1490_v44 }
 0x12b   : > { %v1202_v59 = vpop.f32.mrf.mxu0 }
 0x12c   : > { %v1203_v61 = vadd.f32 %v1202_v59, %v1201_v57  ;;  %1248 = vmatprep.mubr.bf16.mxu1 %v691_v58  ;;  %v683_v63 = vmax.f32 %v667_v60, 0.0 }
 0x12e   : > { %v668_v62 = vadd.f32 %v1203_v61, %v1490_v44 }
 0x130   : > { %v684_v0 = vmax.f32 %v668_v62, 0.0 }
 0x132   : > { %v692_v1 = vpack.c.bf16 %v684_v0, %v683_v63 }
 0x134   : > { %1249 = vmatmul.mubr.bf16.gmra.mxu1 %v692_v1 }
 0x1c4   : > { %v1238_v2 = vpop.f32.mrf.mxu1 }
 0x1c6   : > { %v791_v3 = vpop.f32.mrf.mxu1 }
 0x1c8   : > { %v1239_v4 = vpop.f32.mrf.mxu1 }
 0x1c9   : > { %v1101_v5 = vpack.c.bf16 %v1239_v4, %v1238_v2 }
 0x1ca   : > { %v794_v6 = vpop.f32.mrf.mxu1 }
 0x1cb   : > { %1133 = vst [vmem:[%s230_s7 + $0x8] sm:$0xff] %v1101_v5   ;;  %v1096_v7 = vpack.c.bf16 %v794_v6, %v791_v3 }
 0x1cd   : > { %1097 = vst [vmem:[%s230_s7] sm:$0xff] %v1096_v7  }
 0x1d4   : > { %v1242_v8 = vpop.f32.mrf.mxu1 }
 0x1d6   : > { %v807_v9 = vpop.f32.mrf.mxu1 }
 0x1d8   : > { %v1243_v44 = vpop.f32.mrf.mxu1 }
 0x1d9   : > { %v1111_v10 = vpack.c.bf16 %v1243_v44, %v1242_v8 }
 0x1da   : > { %v810_v11 = vpop.f32.mrf.mxu1 }
 0x1db   : > { %1135 = vst [vmem:[%s230_s7 + $0x18] sm:$0xff] %v1111_v10   ;;  %v1106_v12 = vpack.c.bf16 %v810_v11, %v807_v9 }
 0x1dd   : > { %1134 = vst [vmem:[%s230_s7 + $0x10] sm:$0xff] %v1106_v12  }
 0x1e4   : > { %v1246_v13 = vpop.f32.mrf.mxu1 }
 0x1e6   : > { %v823_v14 = vpop.f32.mrf.mxu1 }
 0x1e8   : > { %v1247_v15 = vpop.f32.mrf.mxu1 }
 0x1e9   : > { %v1121_v16 = vpack.c.bf16 %v1247_v15, %v1246_v13 }
 0x1ea   : > { %v826_v17 = vpop.f32.mrf.mxu1 }
 0x1eb   : > { %1137 = vst [vmem:[%s230_s7 + $0x28] sm:$0xff] %v1121_v16   ;;  %v1116_v18 = vpack.c.bf16 %v826_v17, %v823_v14 }
 0x1ed   : > { %1136 = vst [vmem:[%s230_s7 + $0x20] sm:$0xff] %v1116_v18  }
 0x1f4   : > { %v1250_v19 = vpop.f32.mrf.mxu1 }
 0x1f6   : > { %v839_v20 = vpop.f32.mrf.mxu1 }
 0x1f8   : > { %v1251_v21 = vpop.f32.mrf.mxu1 }
 0x1f9   : > { %v1131_v22 = vpack.c.bf16 %v1251_v21, %v1250_v19 }
 0x1fa   : > { %v842_v23 = vpop.f32.mrf.mxu1 }
 0x1fb   : > { %1139 = vst [vmem:[%s230_s7 + $0x38] sm:$0xff] %v1131_v22   ;;  %v1126_v24 = vpack.c.bf16 %v842_v23, %v839_v20 }
 0x1fd   : > { %1138 = vst [vmem:[%s230_s7 + $0x30] sm:$0xff] %v1126_v24  }
 0x1fe PF: > { %s14_s17 = sadd.s32 1, %s1346_s17   ;;  %s1526_s15 = smov %s1342_s16 }
 0x1ff   : > { %p11_p5 = scmp.ge.s32.totalorder %s14_s17, 4   ;;  %s1527_s16 = smov %s1529_s18 }
 0x201   :  { %13 = sbr.rel (!%p11_p5) target bundleno = 2 (0x2), region = 75 }

// kernel: gnn_classifier_forward.5
= control target key start
LH: loop header
LB: loop body
LE: loop exit
PB: predicated region body
PF: predicated region fallthrough
CT: control target
= control target key end

     0   :  { %s1478_s18 = smov 0   ;;  %s1480_s19 = smov 0   ;;  %s1750_s0 = inlined_call_operand.vmem [shape: bf16[256,256], index: 0, kind: input, shape index: {}]   ;;  %s1751_s1 = inlined_call_operand.vmem [shape: bf16[256,128], index: 1, kind: input, shape index: {}]   ;;  %s1752_s2 = inlined_call_operand.vmem [shape: f32[1,128], index: 2, kind: input, shape index: {}]   ;;  %s1753_s3 = inlined_call_operand.vmem [shape: bf16[128,128], index: 3, kind: input, shape index: {}]   ;;  %s1754_s4 = inlined_call_operand.vmem [shape: f32[1,128], index: 4, kind: input, shape index: {}]   ;;  %s1755_s5 = inlined_call_operand.vmem [shape: f32[256,128], index: 5, kind: output, shape index: {}]  }
   0x1   :  { %s1482_s20 = smov 0  }
   0x2 LB: > { %s27_s21 = sadd.s32 1, %s1442_s19  ;;  %p1125_p0 = scmp.ge.s32.totalorder %s1446_s20, 1  ;;  %s1446_s20 = sphi %s1482_s20, %s15_s20   ;;  %s1442_s19 = sphi %s1480_s19, %s1757_s19   ;;  %s1438_s18 = sphi %s1478_s18, %s1756_s18  }
   0x3   : > { %p29_p1 = scmp.ge.s32.totalorder %s27_s21, 2  ;;  %p208_p2 = scmp.lt.s32.totalorder %s1446_s20, 3 }
   0x5   : > { %s1759_s21 = smov (%p29_p1, %s27_s21), 0  ;;  %p209_p3 = pnand %p1125_p0, %p208_p2 }
   0x6   : > { %s1126_s24 = sshll.u32 (!%p209_p3), %s1438_s18, 4 }
   0x7   : > { %212 = sbr.rel (%p209_p3) target bundleno = 824 (0x338), region = 40  ;;  %p243_p4 = scmp.lt.s32.totalorder (!%p209_p3), %s1126_s24, 31 }
   0xc   : > { %v1312_v0 = vld [vmem:[%s1751_s1 + $0x78] sm:$0xff]   ;;  %v1314_v2 = vld [vmem:[%s1751_s1 + $0x70] sm:$0xff]   ;;  %v1316_v4 = vld [vmem:[%s1751_s1 + $0x68] sm:$0xff]   ;;  %s1761_s24 = smov (!%p243_p4, %s1126_s24), 31 }
   0xd   : > { %v1313_v1 = vld [vmem:[%s1751_s1 + $0x38] sm:$0xff]   ;;  %1176 = vmatprep.subr.bf16.mxu0 %v1312_v0  ;;  %v1315_v3 = vld [vmem:[%s1751_s1 + $0x30] sm:$0xff]   ;;  %v1317_v5 = vld [vmem:[%s1751_s1 + $0x28] sm:$0xff]   ;;  %s1175_s14 = sshll.u32 %s1761_s24, 3 }
   0xe   : > { %1177 = vmatpush3.bf16.msra.mxu0 %v1313_v1  ;;  %v1318_v6 = vld [vmem:[%s1751_s1 + $0x60] sm:$0xff]   ;;  %v1320_v8 = vld [vmem:[%s1751_s1 + $0x58] sm:$0xff]   ;;  %s1531_s22 = scalar_lea.vmem %s1750_s0, %s1175_s14  ;;  %v1322_v10 = vld [vmem:[%s1751_s1 + $0x50] sm:$0xff]   ;;  %s1707_s16 = scalar_lea.vmem %s1755_s5, %s1175_s14 }
   0xf   : > { %1178 = vmatprep.subr.bf16.mxu0 %v1314_v2  ;;  %v1319_v7 = vld [vmem:[%s1751_s1 + $0x20] sm:$0xff]   ;;  %v1321_v9 = vld [vmem:[%s1751_s1 + $0x18] sm:$0xff]   ;;  %v1323_v12 = vld [vmem:[%s1751_s1 + $0x10] sm:$0xff]  }
  0x10   : > { %v1330_v11 = vld [vmem:[%s1531_s22 + $0x4] ss:$8 sps:$4 sm:$0xff]   ;;  %v1352_v17 = vld [vmem:[%s1753_s3 + $0x38] sm:$0xff]   ;;  %v1328_v18 = vld [vmem:[%s1531_s22] ss:$8 sps:$4 sm:$0xff]  }
  0x11   : > { %557 = vmatprep.mubr.bf16.mxu0 %v1330_v11  ;;  %v1324_v13 = vld [vmem:[%s1751_s1 + $0x48] sm:$0xff]   ;;  %v1326_v15 = vld [vmem:[%s1751_s1 + $0x40] sm:$0xff]   ;;  %v1353_v19 = vld [vmem:[%s1753_s3 + $0x30] sm:$0xff]   ;;  %1256 = vmatprep.subr.bf16.mxu1 %v1352_v17 }
  0x12   : > { %1179 = vmatpush3.bf16.msra.mxu0 %v1315_v3  ;;  %v1325_v14 = vld [vmem:[%s1751_s1 + $0x8] sm:$0xff]   ;;  %v1327_v16 = vld [vmem:[%s1751_s1] sm:$0xff]   ;;  %v1331_v20 = vld [vmem:[%s1531_s22 + $0x14] ss:$8 sps:$4 sm:$0xff]   ;;  %1257 = vmatpush3.bf16.msra.mxu1 %v1352_v17 }
  0x13   : > { %1180 = vmatprep.subr.bf16.mxu0 %v1316_v4  ;;  %v1354_v21 = vld [vmem:[%s1753_s3 + $0x28] sm:$0xff]   ;;  %1258 = vmatprep.subr.bf16.mxu1 %v1353_v19  ;;  %v1333_v22 = vld [vmem:[%s1531_s22 + $0x10] ss:$8 sps:$4 sm:$0xff]   ;;  %v1337_v25 = vld [vmem:[%s1531_s22 + $0x34] ss:$8 sps:$4 sm:$0xff]  }
  0x14   : > { %v1334_v23 = vld [vmem:[%s1531_s22 + $0x24] ss:$8 sps:$4 sm:$0xff]   ;;  %v1336_v24 = vld [vmem:[%s1531_s22 + $0x20] ss:$8 sps:$4 sm:$0xff]   ;;  %v1339_v26 = vld [vmem:[%s1531_s22 + $0x30] ss:$8 sps:$4 sm:$0xff]  }
  0x15   : > { %v1340_v27 = vld [vmem:[%s1531_s22 + $0x44] ss:$8 sps:$4 sm:$0xff]   ;;  %v1342_v28 = vld [vmem:[%s1531_s22 + $0x40] ss:$8 sps:$4 sm:$0xff]   ;;  %v1343_v29 = vld [vmem:[%s1531_s22 + $0x54] ss:$8 sps:$4 sm:$0xff]  }
  0x16   : > { %1181 = vmatpush3.bf16.msra.mxu0 %v1317_v5  ;;  %1259 = vmatpush3.bf16.msra.mxu1 %v1353_v19  ;;  %v1345_v30 = vld [vmem:[%s1531_s22 + $0x50] ss:$8 sps:$4 sm:$0xff]   ;;  %v1346_v31 = vld [vmem:[%s1531_s22 + $0x64] ss:$8 sps:$4 sm:$0xff]   ;;  %v1348_v32 = vld [vmem:[%s1531_s22 + $0x60] ss:$8 sps:$4 sm:$0xff]  }
  0x17   : > { %1182 = vmatprep.subr.bf16.mxu0 %v1318_v6  ;;  %1260 = vmatprep.subr.bf16.mxu1 %v1354_v21  ;;  %v1349_v33 = vld [vmem:[%s1531_s22 + $0x74] ss:$8 sps:$4 sm:$0xff]   ;;  %v1351_v34 = vld [vmem:[%s1531_s22 + $0x70] ss:$8 sps:$4 sm:$0xff]   ;;  %v1355_v35 = vld [vmem:[%s1753_s3 + $0x20] sm:$0xff]  }
  0x18   : > { %v1356_v36 = vld [vmem:[%s1753_s3 + $0x18] sm:$0xff]   ;;  %v1357_v37 = vld [vmem:[%s1753_s3 + $0x10] sm:$0xff]   ;;  %v1358_v38 = vld [vmem:[%s1753_s3 + $0x8] sm:$0xff]  }
  0x19   : > { %v1359_v39 = vld [vmem:[%s1753_s3] sm:$0xff]  }
  0x1a   : > { %1183 = vmatpush3.bf16.msra.mxu0 %v1319_v7  ;;  %1261 = vmatpush3.bf16.msra.mxu1 %v1354_v21  ;;  %v1597_v44 = vld [vmem:[%s1752_s2] ss:$0 sm:$0xff] }
  0x1b   : > { %1184 = vmatprep.subr.bf16.mxu0 %v1320_v8  ;;  %1262 = vmatprep.subr.bf16.mxu1 %v1355_v35 }
  0x1e   : > { %1185 = vmatpush3.bf16.msra.mxu0 %v1321_v9  ;;  %1263 = vmatpush3.bf16.msra.mxu1 %v1355_v35 }
  0x1f   : > { %1186 = vmatprep.subr.bf16.mxu0 %v1322_v10  ;;  %1264 = vmatprep.subr.bf16.mxu1 %v1356_v36 }
  0x22   : > { %1187 = vmatpush3.bf16.msra.mxu0 %v1323_v12  ;;  %1265 = vmatpush3.bf16.msra.mxu1 %v1356_v36 }
  0x23   : > { %1188 = vmatprep.subr.bf16.mxu0 %v1324_v13  ;;  %1266 = vmatprep.subr.bf16.mxu1 %v1357_v37 }
  0x26   : > { %1189 = vmatpush3.bf16.msra.mxu0 %v1325_v14  ;;  %1267 = vmatpush3.bf16.msra.mxu1 %v1357_v37 }
  0x27   : > { %1190 = vmatprep.subr.bf16.mxu0 %v1326_v15  ;;  %1268 = vmatprep.subr.bf16.mxu1 %v1358_v38 }
  0x2a   : > { %1191 = vmatpush3.bf16.msra.mxu0 %v1327_v16  ;;  %1269 = vmatpush3.bf16.msra.mxu1 %v1358_v38 }
  0x2b   : > { %1270 = vmatprep.subr.bf16.mxu1 %v1359_v39 }
  0x2d   : > { %558 = vmatmul.mubr.bf16.vlgmr.msra.gmra.mxu0 %v1328_v18 }
  0x2e   : > { %565 = vmatprep.mubr.bf16.mxu0 %v1331_v20  ;;  %1271 = vmatpush3.bf16.msra.mxu1 %v1359_v39 }
  0x35   : > { %566 = vmatmul.mubr.bf16.gmra.mxu0 %v1333_v22 }
  0x36   : > { %573 = vmatprep.mubr.bf16.mxu0 %v1334_v23 }
  0x3d   : > { %574 = vmatmul.mubr.bf16.gmra.mxu0 %v1336_v24 }
  0x3e   : > { %581 = vmatprep.mubr.bf16.mxu0 %v1337_v25 }
  0x45   : > { %582 = vmatmul.mubr.bf16.gmra.mxu0 %v1339_v26 }
  0x46   : > { %589 = vmatprep.mubr.bf16.mxu0 %v1340_v27 }
  0x4d   : > { %590 = vmatmul.mubr.bf16.gmra.mxu0 %v1342_v28 }
  0x4e   : > { %597 = vmatprep.mubr.bf16.mxu0 %v1343_v29 }
  0x55   : > { %598 = vmatmul.mubr.bf16.gmra.mxu0 %v1345_v30 }
  0x56   : > { %605 = vmatprep.mubr.bf16.mxu0 %v1346_v31 }
  0x5d   : > { %606 = vmatmul.mubr.bf16.gmra.mxu0 %v1348_v32 }
  0x5e   : > { %613 = vmatprep.mubr.bf16.mxu0 %v1349_v33 }
  0x65   : > { %614 = vmatmul.mubr.bf16.gmra.mxu0 %v1351_v34 }
  0xed   : > { %v1192_v40 = vpop.f32.mrf.mxu0 }
  0xef   : > { %v1193_v41 = vpop.f32.mrf.mxu0 }
  0xf0   : > { %v1194_v42 = vadd.f32 %v1193_v41, %v1192_v40 }
  0xf1   : > { %v1195_v43 = vpop.f32.mrf.mxu0 }
  0xf2   : > { %v680_v47 = vadd.f32 %v1194_v42, %v1597_v44 }
  0xf3   : > { %v1196_v45 = vpop.f32.mrf.mxu0 }
  0xf4   : > { %v1197_v46 = vadd.f32 %v1196_v45, %v1195_v43  ;;  %v696_v52 = vmax.f32 %v680_v47, 0.0 }
  0xf5   : > { %v1198_v48 = vpop.f32.mrf.mxu0 }
  0xf6   : > { %v681_v49 = vadd.f32 %v1197_v46, %v1597_v44 }
  0xf7   : > { %v1199_v50 = vpop.f32.mrf.mxu0 }
  0xf8   : > { %v1200_v51 = vadd.f32 %v1199_v50, %v1198_v48  ;;  %v697_v53 = vmax.f32 %v681_v49, 0.0 }
  0xf9   : > { %v1201_v54 = vpop.f32.mrf.mxu0 }
  0xfa   : > { %v712_v55 = vpack.c.bf16 %v697_v53, %v696_v52  ;;  %v682_v57 = vadd.f32 %v1200_v51, %v1597_v44 }
  0xfb   : > { %v1202_v56 = vpop.f32.mrf.mxu0 }
  0xfc   : > { %v1203_v58 = vadd.f32 %v1202_v56, %v1201_v54  ;;  %1272 = vmatprep.mubr.bf16.mxu1 %v712_v55  ;;  %v698_v62 = vmax.f32 %v682_v57, 0.0 }
  0xfd   : > { %v1204_v59 = vpop.f32.mrf.mxu0 }
  0xfe   : > { %v683_v60 = vadd.f32 %v1203_v58, %v1597_v44 }
  0xff   : > { %v1205_v61 = vpop.f32.mrf.mxu0 }
 0x100   : > { %v699_v63 = vmax.f32 %v683_v60, 0.0  ;;  %v1206_v0 = vadd.f32 %v1205_v61, %v1204_v59 }
 0x101   : > { %v1207_v1 = vpop.f32.mrf.mxu0 }
 0x102   : > { %v713_v2 = vpack.c.bf16 %v699_v63, %v698_v62  ;;  %v684_v4 = vadd.f32 %v1206_v0, %v1597_v44 }
 0x103   : > { %v1208_v3 = vpop.f32.mrf.mxu0 }
 0x104   : > { %v1209_v5 = vadd.f32 %v1208_v3, %v1207_v1  ;;  %1273 = vmatmul.mubr.bf16.vlgmr.msra.gmra.mxu1 %v713_v2  ;;  %v700_v9 = vmax.f32 %v684_v4, 0.0  ;;  %v1164_v2 = vld [vmem:[%s1754_s4] ss:$0 sm:$0xff] }
 0x105   : > { %v1210_v6 = vpop.f32.mrf.mxu0 }
 0x106   : > { %v685_v7 = vadd.f32 %v1209_v5, %v1597_v44 }
 0x107   : > { %v1211_v8 = vpop.f32.mrf.mxu0 }
 0x108   : > { %v701_v10 = vmax.f32 %v685_v7, 0.0  ;;  %v1212_v11 = vadd.f32 %v1211_v8, %v1210_v6 }
 0x109   : > { %v1213_v12 = vpop.f32.mrf.mxu0 }
 0x10a   : > { %v714_v13 = vpack.c.bf16 %v701_v10, %v700_v9  ;;  %v686_v15 = vadd.f32 %v1212_v11, %v1597_v44 }
 0x10b   : > { %v1214_v14 = vpop.f32.mrf.mxu0 }
 0x10c   : > { %v1215_v16 = vadd.f32 %v1214_v14, %v1213_v12  ;;  %1276 = vmatprep.mubr.bf16.mxu1 %v714_v13  ;;  %v702_v20 = vmax.f32 %v686_v15, 0.0 }
 0x10d   : > { %v1216_v17 = vpop.f32.mrf.mxu0 }
 0x10e   : > { %v687_v18 = vadd.f32 %v1215_v16, %v1597_v44 }
 0x10f   : > { %v1217_v19 = vpop.f32.mrf.mxu0 }
 0x110   : > { %v703_v21 = vmax.f32 %v687_v18, 0.0  ;;  %v1218_v22 = vadd.f32 %v1217_v19, %v1216_v17 }
 0x111   : > { %v1219_v23 = vpop.f32.mrf.mxu0 }
 0x112   : > { %v715_v24 = vpack.c.bf16 %v703_v21, %v702_v20  ;;  %v688_v26 = vadd.f32 %v1218_v22, %v1597_v44 }
 0x113   : > { %v1220_v25 = vpop.f32.mrf.mxu0 }
 0x114   : > { %v1221_v27 = vadd.f32 %v1220_v25, %v1219_v23  ;;  %1277 = vmatmul.mubr.bf16.gmra.mxu1 %v715_v24  ;;  %v704_v31 = vmax.f32 %v688_v26, 0.0 }
 0x115   : > { %v1222_v28 = vpop.f32.mrf.mxu0 }
 0x116   : > { %v689_v29 = vadd.f32 %v1221_v27, %v1597_v44 }
 0x117   : > { %v1223_v30 = vpop.f32.mrf.mxu0 }
 0x118   : > { %v705_v32 = vmax.f32 %v689_v29, 0.0  ;;  %v1224_v33 = vadd.f32 %v1223_v30, %v1222_v28 }
 0x119   : > { %v1225_v34 = vpop.f32.mrf.mxu0 }
 0x11a   : > { %v716_v35 = vpack.c.bf16 %v705_v32, %v704_v31  ;;  %v690_v37 = vadd.f32 %v1224_v33, %v1597_v44 }
 0x11b   : > { %v1226_v36 = vpop.f32.mrf.mxu0 }
 0x11c   : > { %v1227_v38 = vadd.f32 %v1226_v36, %v1225_v34  ;;  %1280 = vmatprep.mubr.bf16.mxu1 %v716_v35  ;;  %v706_v42 = vmax.f32 %v690_v37, 0.0 }
 0x11d   : > { %v1228_v39 = vpop.f32.mrf.mxu0 }
 0x11e   : > { %v691_v40 = vadd.f32 %v1227_v38, %v1597_v44 }
 0x11f   : > { %v1229_v41 = vpop.f32.mrf.mxu0 }
 0x120   : > { %v707_v43 = vmax.f32 %v691_v40, 0.0  ;;  %v1230_v45 = vadd.f32 %v1229_v41, %v1228_v39 }
 0x121   : > { %v1231_v46 = vpop.f32.mrf.mxu0 }
 0x122   : > { %v717_v47 = vpack.c.bf16 %v707_v43, %v706_v42  ;;  %v692_v49 = vadd.f32 %v1230_v45, %v1597_v44 }
 0x123   : > { %v1232_v48 = vpop.f32.mrf.mxu0 }
 0x124   : > { %v1233_v50 = vadd.f32 %v1232_v48, %v1231_v46  ;;  %1281 = vmatmul.mubr.bf16.gmra.mxu1 %v717_v47  ;;  %v708_v54 = vmax.f32 %v692_v49, 0.0 }
 0x125   : > { %v1234_v51 = vpop.f32.mrf.mxu0 }
 0x126   : > { %v693_v52 = vadd.f32 %v1233_v50, %v1597_v44 }
 0x127   : > { %v1235_v53 = vpop.f32.mrf.mxu0 }
 0x128   : > { %v709_v55 = vmax.f32 %v693_v52, 0.0  ;;  %v1236_v56 = vadd.f32 %v1235_v53, %v1234_v51 }
 0x129   : > { %v1237_v57 = vpop.f32.mrf.mxu0 }
 0x12a   : > { %v718_v58 = vpack.c.bf16 %v709_v55, %v708_v54  ;;  %v694_v60 = vadd.f32 %v1236_v56, %v1597_v44 }
 0x12b   : > { %v1238_v59 = vpop.f32.mrf.mxu0 }
 0x12c   : > { %v1239_v61 = vadd.f32 %v1238_v59, %v1237_v57  ;;  %1284 = vmatprep.mubr.bf16.mxu1 %v718_v58  ;;  %v710_v63 = vmax.f32 %v694_v60, 0.0 }
 0x12e   : > { %v695_v62 = vadd.f32 %v1239_v61, %v1597_v44 }
 0x130   : > { %v711_v0 = vmax.f32 %v695_v62, 0.0 }
 0x132   : > { %v719_v1 = vpack.c.bf16 %v711_v0, %v710_v63 }
 0x134   : > { %1285 = vmatmul.mubr.bf16.gmra.mxu1 %v719_v1 }
 0x1c4   : > { %v1274_v3 = vpop.f32.mrf.mxu1 }
 0x1c5   : > { %v834_v4 = vadd.f32 %v1274_v3, %v1164_v2 }
 0x1c6   : > { %v825_v5 = vpop.f32.mrf.mxu1 }
 0x1c7   : > { %v826_v6 = vadd.f32 %v1164_v2, %v825_v5  ;;  %892 = vmax.xlane.f32.xlu1 %v834_v4 }
 0x1c8   : > { %v1275_v7 = vpop.f32.mrf.mxu1 }
 0x1c9   : > { %v837_v8 = vadd.f32 %v1275_v7, %v1164_v2  ;;  %888 = vmax.xlane.f32.xlu0 %v826_v6 }
 0x1ca   : > { %v828_v9 = vpop.f32.mrf.mxu1 }
 0x1cb   : > { %v829_v10 = vadd.f32 %v1164_v2, %v828_v9  ;;  %894 = vmax.xlane.f32.xlu1 %v837_v8 }
 0x1cd   : > { %890 = vmax.xlane.f32.xlu0 %v829_v10 }
 0x1d4   : > { %v1278_v44 = vpop.f32.mrf.mxu1 }
 0x1d5   : > { %v850_v11 = vadd.f32 %v1278_v44, %v1164_v2 }
 0x1d6   : > { %v841_v12 = vpop.f32.mrf.mxu1 }
 0x1d7   : > { %900 = vmax.xlane.f32.xlu0 %v850_v11  ;;  %v842_v14 = vadd.f32 %v1164_v2, %v841_v12 }
 0x1d8   : > { %v1279_v13 = vpop.f32.mrf.mxu1 }
 0x1d9   : > { %v853_v15 = vadd.f32 %v1279_v13, %v1164_v2 }
 0x1da   : > { %v844_v16 = vpop.f32.mrf.mxu1 }
 0x1db   : > { %902 = vmax.xlane.f32.xlu1 %v853_v15  ;;  %896 = vmax.xlane.f32.xlu0 %v842_v14  ;;  %v1618_v17 = vadd.f32 %v1164_v2, %v844_v16 }
 0x1df   : > { %898 = vmax.xlane.f32.xlu1 %v1618_v17 }
 0x1e4   : > { %v1282_v18 = vpop.f32.mrf.mxu1 }
 0x1e5   : > { %v1621_v19 = vadd.f32 %v1282_v18, %v1164_v2 }
 0x1e6   : > { %v857_v20 = vpop.f32.mrf.mxu1 }
 0x1e7   : > { %908 = vmax.xlane.f32.xlu0 %v1621_v19  ;;  %v1624_v22 = vadd.f32 %v1164_v2, %v857_v20 }
 0x1e8   : > { %v1283_v21 = vpop.f32.mrf.mxu1 }
 0x1e9   : > { %v1626_v23 = vadd.f32 %v1283_v21, %v1164_v2 }
 0x1ea   : > { %v860_v24 = vpop.f32.mrf.mxu1 }
 0x1eb   : > { %910 = vmax.xlane.f32.xlu1 %v1626_v23  ;;  %904 = vmax.xlane.f32.xlu0 %v1624_v22  ;;  %v1630_v25 = vadd.f32 %v1164_v2, %v860_v24 }
 0x1ef   : > { %906 = vmax.xlane.f32.xlu1 %v1630_v25 }
 0x1f4   : > { %v1286_v26 = vpop.f32.mrf.mxu1 }
 0x1f5   : > { %v1636_v31 = vadd.f32 %v1286_v26, %v1164_v2 }
 0x1f6   : > { %v873_v27 = vpop.f32.mrf.mxu1 }
 0x1f7   : > { %v1633_v28 = vadd.f32 %v1164_v2, %v873_v27 }
 0x1f8   : > { %v1287_v29 = vpop.f32.mrf.mxu1 }
 0x1f9   : > { %912 = vmax.xlane.f32.xlu0 %v1633_v28  ;;  %v1642_v33 = vadd.f32 %v1287_v29, %v1164_v2 }
 0x1fa   : > { %v876_v30 = vpop.f32.mrf.mxu1 }
 0x1fb   : > { %v1638_v32 = vadd.f32 %v1164_v2, %v876_v30 }
 0x1fd   : > { %914 = vmax.xlane.f32.xlu1 %v1638_v32  ;;  %916 = vmax.xlane.f32.xlu0 %v1636_v31 }
 0x201   : > { %918 = vmax.xlane.f32.xlu1 %v1642_v33 }
 0x250   : > { %v893_v34 = vpop.xlane.xlu1 %892 }
 0x251   : > { %v922_v35 = vsub.f32 %v834_v4, %v893_v34 }
 0x252   : > { %v889_v36 = vpop.xlane.xlu0 %888 }
 0x253   : > { %v940_v37 = vmul.f32 1.442695, %v922_v35  ;;  %v920_v38 = vsub.f32 %v826_v6, %v889_v36 }
 0x254   : > { %v895_v39 = vpop.xlane.xlu1 %894 }
 0x255   : > { %1360 = vpow2.f32 %v940_v37  ;;  %v936_v40 = vmul.f32 1.442695, %v920_v38  ;;  %v923_v41 = vsub.f32 %v837_v8, %v895_v39 }
 0x256   : > { %v891_v42 = vpop.xlane.xlu0 %890 }
 0x257   : > { %v942_v43 = vmul.f32 1.442695, %v923_v41  ;;  %v921_v45 = vsub.f32 %v829_v10, %v891_v42  ;;  %1362 = vpow2.f32 %v936_v40 }
 0x259   : > { %1364 = vpow2.f32 %v942_v43  ;;  %v938_v46 = vmul.f32 1.442695, %v921_v45 }
 0x25b   : > { %1366 = vpow2.f32 %v938_v46 }
 0x260   : > { %v901_v47 = vpop.xlane.xlu0 %900 }
 0x261   : > { %v926_v48 = vsub.f32 %v850_v11, %v901_v47 }
 0x262   : > { %v1645_v49 = vpop.eup %1360 }
 0x263   : > { %v948_v50 = vmul.f32 1.442695, %v926_v48  ;;  %972 = vadd.xlane.f32.xlu0 %v1645_v49 }
 0x264   : > { %v903_v51 = vpop.xlane.xlu1 %902  ;;  %v897_v52 = vpop.xlane.xlu0 %896 }
 0x265   : > { %v1648_v53 = vpop.eup %1362  ;;  %1368 = vpow2.f32 %v948_v50  ;;  %v927_v54 = vsub.f32 %v853_v15, %v903_v51  ;;  %v924_v55 = vsub.f32 %v842_v14, %v897_v52 }
 0x266   : > { %v1650_v56 = vpop.eup %1364 }
 0x267   : > { %v950_v57 = vmul.f32 1.442695, %v927_v54  ;;  %v944_v58 = vmul.f32 1.442695, %v924_v55  ;;  %974 = vadd.xlane.f32.xlu1 %v1650_v56  ;;  %968 = vadd.xlane.f32.xlu0 %v1648_v53 }
 0x268   : > { %v899_v59 = vpop.xlane.xlu1 %898  ;;  %v1655_v61 = vpop.eup %1366 }
 0x269   : > { %1370 = vpow2.f32 %v950_v57  ;;  %v925_v60 = vsub.f32 %v1618_v17, %v899_v59 }
 0x26a   : > { %1372 = vpow2.f32 %v944_v58 }
 0x26b   : > { %v946_v62 = vmul.f32 1.442695, %v925_v60  ;;  %970 = vadd.xlane.f32.xlu1 %v1655_v61 }
 0x26d   : > { %1374 = vpow2.f32 %v946_v62 }
 0x270   : > { %v909_v63 = vpop.xlane.xlu0 %908 }
 0x271   : > { %v930_v0 = vsub.f32 %v1621_v19, %v909_v63 }
 0x272   : > { %v1659_v1 = vpop.eup %1368 }
 0x273   : > { %v956_v2 = vmul.f32 1.442695, %v930_v0  ;;  %980 = vadd.xlane.f32.xlu0 %v1659_v1 }
 0x274   : > { %v911_v3 = vpop.xlane.xlu1 %910  ;;  %v905_v4 = vpop.xlane.xlu0 %904 }
 0x275   : > { %1376 = vpow2.f32 %v956_v2  ;;  %v931_v5 = vsub.f32 %v1626_v23, %v911_v3  ;;  %v928_v6 = vsub.f32 %v1624_v22, %v905_v4 }
 0x276   : > { %v1664_v7 = vpop.eup %1370 }
 0x277   : > { %v1666_v8 = vpop.eup %1372  ;;  %v958_v9 = vmul.f32 1.442695, %v931_v5  ;;  %v952_v10 = vmul.f32 1.442695, %v928_v6  ;;  %982 = vadd.xlane.f32.xlu1 %v1664_v7 }
 0x278   : > { %976 = vadd.xlane.f32.xlu0 %v1666_v8  ;;  %v907_v44 = vpop.xlane.xlu1 %906 }
 0x279   : > { %1378 = vpow2.f32 %v958_v9  ;;  %v929_v11 = vsub.f32 %v1630_v25, %v907_v44 }
 0x27a   : > { %v1671_v12 = vpop.eup %1374  ;;  %1380 = vpow2.f32 %v952_v10 }
 0x27b   : > { %v954_v13 = vmul.f32 1.442695, %v929_v11  ;;  %978 = vadd.xlane.f32.xlu1 %v1671_v12 }
 0x27d   : > { %1382 = vpow2.f32 %v954_v13 }
 0x282   : > { %v1674_v14 = vpop.eup %1376  ;;  %v913_v15 = vpop.xlane.xlu0 %912 }
 0x283   : > { %v932_v16 = vsub.f32 %v1633_v28, %v913_v15  ;;  %988 = vadd.xlane.f32.xlu0 %v1674_v14 }
 0x285   : > { %v960_v17 = vmul.f32 1.442695, %v932_v16 }
 0x286   : > { %v1678_v18 = vpop.eup %1378  ;;  %v915_v19 = vpop.xlane.xlu1 %914 }
 0x287   : > { %v917_v20 = vpop.xlane.xlu0 %916  ;;  %v1680_v21 = vpop.eup %1380  ;;  %1384 = vpow2.f32 %v960_v17  ;;  %v933_v22 = vsub.f32 %v1638_v32, %v915_v19  ;;  %990 = vadd.xlane.f32.xlu1 %v1678_v18 }
 0x288   : > { %v934_v23 = vsub.f32 %v1636_v31, %v917_v20  ;;  %984 = vadd.xlane.f32.xlu0 %v1680_v21 }
 0x289   : > { %v962_v24 = vmul.f32 1.442695, %v933_v22 }
 0x28a   : > { %v964_v25 = vmul.f32 1.442695, %v934_v23  ;;  %v1686_v26 = vpop.eup %1382  ;;  %v919_v27 = vpop.xlane.xlu1 %918 }
 0x28b   : > { %1386 = vpow2.f32 %v962_v24  ;;  %v935_v28 = vsub.f32 %v1642_v33, %v919_v27  ;;  %986 = vadd.xlane.f32.xlu1 %v1686_v26 }
 0x28c   : > { %1388 = vpow2.f32 %v964_v25 }
 0x28d   : > { %v966_v29 = vmul.f32 1.442695, %v935_v28 }
 0x28f   : > { %1390 = vpow2.f32 %v966_v29 }
 0x294   : > { %v1690_v30 = vpop.eup %1384 }
 0x295   : > { %992 = vadd.xlane.f32.xlu0 %v1690_v30 }
 0x298   : > { %v1693_v31 = vpop.eup %1386 }
 0x299   : > { %v1695_v32 = vpop.eup %1388  ;;  %994 = vadd.xlane.f32.xlu1 %v1693_v31 }
 0x29a   : > { %996 = vadd.xlane.f32.xlu0 %v1695_v32 }
 0x29c   : > { %v1699_v34 = vpop.eup %1390 }
 0x29d   : > { %998 = vadd.xlane.f32.xlu1 %v1699_v34 }
 0x2ec   : > { %v973_v33 = vpop.xlane.xlu0 %972 }
 0x2ed   : > { %1392 = vrcp.f32 %v973_v33 }
 0x2f0   : > { %v975_v35 = vpop.xlane.xlu1 %974  ;;  %v969_v36 = vpop.xlane.xlu0 %968 }
 0x2f1   : > { %1394 = vrcp.f32 %v975_v35 }
 0x2f2   : > { %1396 = vrcp.f32 %v969_v36 }
 0x2f4   : > { %v971_v37 = vpop.xlane.xlu1 %970 }
 0x2f5   : > { %1398 = vrcp.f32 %v971_v37 }
 0x2fa   : > { %v1393_v38 = vpop.eup %1392 }
 0x2fb   : > { %v1018_v39 = vmul.f32 %v1393_v38, %v1645_v49 }
 0x2fc   : > { %v981_v40 = vpop.xlane.xlu0 %980 }
 0x2fd   : > { %1034 = vst [vmem:[%s1707_s16 + $0x10] sm:$0xff] %v1018_v39  ;;  %1400 = vrcp.f32 %v981_v40 }
 0x2fe   : > { %v1395_v41 = vpop.eup %1394 }
 0x2ff   : > { %v1397_v42 = vpop.eup %1396  ;;  %v1019_v43 = vmul.f32 %v1395_v41, %v1650_v56 }
 0x300   : > { %v1016_v45 = vmul.f32 %v1397_v42, %v1648_v53  ;;  %v983_v46 = vpop.xlane.xlu1 %982 }
 0x301   : > { %1035 = vst [vmem:[%s1707_s16 + $0x18] sm:$0xff] %v1019_v43  ;;  %1402 = vrcp.f32 %v983_v46  ;;  %v977_v47 = vpop.xlane.xlu0 %976 }
 0x302   : > { %v1399_v48 = vpop.eup %1398  ;;  %1032 = vst [vmem:[%s1707_s16] sm:$0xff] %v1016_v45  ;;  %1404 = vrcp.f32 %v977_v47 }
 0x303   : > { %v1017_v49 = vmul.f32 %v1399_v48, %v1655_v61 }
 0x304   : > { %v979_v50 = vpop.xlane.xlu1 %978 }
 0x305   : > { %1033 = vst [vmem:[%s1707_s16 + $0x8] sm:$0xff] %v1017_v49  ;;  %1406 = vrcp.f32 %v979_v50 }
 0x30a   : > { %v1401_v51 = vpop.eup %1400 }
 0x30b   : > { %v1022_v52 = vmul.f32 %v1401_v51, %v1659_v1 }
 0x30c   : > { %v989_v54 = vpop.xlane.xlu0 %988 }
 0x30d   : > { %1038 = vst [vmem:[%s1707_s16 + $0x30] sm:$0xff] %v1022_v52  ;;  %1408 = vrcp.f32 %v989_v54 }
 0x30e   : > { %v1403_v53 = vpop.eup %1402 }
 0x30f   : > { %v1405_v55 = vpop.eup %1404  ;;  %v1023_v56 = vmul.f32 %v1403_v53, %v1664_v7 }
 0x310   : > { %v1020_v57 = vmul.f32 %v1405_v55, %v1666_v8  ;;  %v991_v58 = vpop.xlane.xlu1 %990 }
 0x311   : > { %1039 = vst [vmem:[%s1707_s16 + $0x38] sm:$0xff] %v1023_v56  ;;  %1410 = vrcp.f32 %v991_v58  ;;  %v985_v59 = vpop.xlane.xlu0 %984 }
 0x312   : > { %v1407_v60 = vpop.eup %1406  ;;  %1036 = vst [vmem:[%s1707_s16 + $0x20] sm:$0xff] %v1020_v57  ;;  %1412 = vrcp.f32 %v985_v59 }
 0x313   : > { %v1021_v61 = vmul.f32 %v1407_v60, %v1671_v12 }
 0x314   : > { %v987_v62 = vpop.xlane.xlu1 %986 }
 0x315   : > { %1037 = vst [vmem:[%s1707_s16 + $0x28] sm:$0xff] %v1021_v61  ;;  %1414 = vrcp.f32 %v987_v62 }
 0x31a   : > { %v1409_v63 = vpop.eup %1408 }
 0x31b   : > { %v1026_v0 = vmul.f32 %v1409_v63, %v1674_v14 }
 0x31d   : > { %1042 = vst [vmem:[%s1707_s16 + $0x50] sm:$0xff] %v1026_v0 }
 0x31e   : > { %v1411_v1 = vpop.eup %1410  ;;  %v993_v2 = vpop.xlane.xlu0 %992 }
 0x31f   : > { %v1413_v3 = vpop.eup %1412  ;;  %v1027_v4 = vmul.f32 %v1411_v1, %v1678_v18  ;;  %1416 = vrcp.f32 %v993_v2 }
 0x320   : > { %v1024_v5 = vmul.f32 %v1413_v3, %v1680_v21 }
 0x321   : > { %1043 = vst [vmem:[%s1707_s16 + $0x58] sm:$0xff] %v1027_v4 }
 0x322   : > { %v1415_v6 = vpop.eup %1414  ;;  %1040 = vst [vmem:[%s1707_s16 + $0x40] sm:$0xff] %v1024_v5  ;;  %v995_v7 = vpop.xlane.xlu1 %994 }
 0x323   : > { %v1025_v8 = vmul.f32 %v1415_v6, %v1686_v26  ;;  %1418 = vrcp.f32 %v995_v7  ;;  %v997_v9 = vpop.xlane.xlu0 %996 }
 0x324   : > { %1420 = vrcp.f32 %v997_v9 }
 0x325   : > { %1041 = vst [vmem:[%s1707_s16 + $0x48] sm:$0xff] %v1025_v8 }
 0x326   : > { %v999_v10 = vpop.xlane.xlu1 %998 }
 0x327   : > { %1422 = vrcp.f32 %v999_v10 }
 0x32c   : > { %v1417_v44 = vpop.eup %1416 }
 0x32d   : > { %v1028_v11 = vmul.f32 %v1417_v44, %v1690_v30 }
 0x32f   : > { %1044 = vst [vmem:[%s1707_s16 + $0x60] sm:$0xff] %v1028_v11 }
 0x330   : > { %v1419_v12 = vpop.eup %1418 }
 0x331   : > { %v1421_v13 = vpop.eup %1420  ;;  %v1029_v14 = vmul.f32 %v1419_v12, %v1693_v31 }
 0x332   : > { %v1030_v15 = vmul.f32 %v1421_v13, %v1695_v32 }
 0x333   : > { %1045 = vst [vmem:[%s1707_s16 + $0x68] sm:$0xff] %v1029_v14 }
 0x334   : > { %v1423_v16 = vpop.eup %1422  ;;  %1046 = vst [vmem:[%s1707_s16 + $0x70] sm:$0xff] %v1030_v15 }
 0x335   : > { %v1031_v17 = vmul.f32 %v1423_v16, %v1699_v34 }
 0x337   : > { %1047 = vst [vmem:[%s1707_s16 + $0x78] sm:$0xff] %v1031_v17 }
 0x338 PF: > { %s15_s20 = sadd.s32 1, %s1446_s20   ;;  %s1756_s18 = smov %s1442_s19 }
 0x339   : > { %p12_p5 = scmp.ge.s32.totalorder %s15_s20, 4   ;;  %s1757_s19 = smov %s1759_s21 }
 0x33b   :  { %14 = sbr.rel (!%p12_p5) target bundleno = 2 (0x2), region = 79 }

</bundles_post_ra>
